<compile_context>
chip_gen: v7x
topology: tpu7x:2x2x1
jax: 0.10.0
libtpu: 0.0.40
codegen_flags: <defaults>
</compile_context>

<pallas_src>
import jax
import jax.numpy as jnp
import numpy as np
from jax import lax
from jax.experimental import pallas as pl
from jax.experimental.pallas import tpu as pltpu


def _sigmoid_exact(x):
    return 1.0 / (1.0 + jnp.exp(-x))


# ----------------------------- Pallas kernel ------------------------------- #
def make_lstm_lm_kernel(nlayers, T, B, H, compute_dtype, approx_sigmoid):
    """Fused embedding + multi-layer LSTM + decoder; single invocation."""

    def sigmoid(x):
        if approx_sigmoid:
            # exp + reciprocal both live on the EUP slot (co-issues with VPU math)
            return pl.reciprocal(1.0 + jnp.exp(-x), approx=True)
        return 1.0 / (1.0 + jnp.exp(-x))

    def kernel(*refs):
        ids_ref, embT_ref, h0_ref, c0_ref = refs[:4]
        w_refs = refs[4:4 + 3 * nlayers]          # per layer: wih, whh, b
        wd_ref = refs[4 + 3 * nlayers]            # (H, ntoken_pad)
        bd_ref = refs[5 + 3 * nlayers]            # (1, ntoken_pad)
        d_ref = refs[6 + 3 * nlayers]             # (T*B, ntoken_pad)
        hT_ref = refs[7 + 3 * nlayers]            # (nlayers, B, H)  (aliases h0)
        cT_ref = refs[8 + 3 * nlayers]            # (nlayers, B, H)  (aliases c0)

        TB = T * B
        ntoken = embT_ref.shape[1]

        # ---- in-kernel embedding gather (self.encoder): exact select + sum.
        # No XLA gather op, no HBM round-trip of the embedded activations.
        ids = ids_ref[...]                                            # (TB, 1) int32
        sel = lax.broadcasted_iota(jnp.int32, (TB, ntoken), 1) == ids  # (TB, ntoken)
        embT = embT_ref[...]                                          # (ninp, ntoken)
        layer_in = jnp.sum(sel[:, None, :].astype(jnp.float32) * embT[None, :, :],
                           axis=-1)                                   # (TB, ninp) f32
        # NOTE: self.drop (Dropout) is identity in eval mode.

        for l in range(nlayers):                  # nlayers is small & static
            wih = w_refs[3 * l][...].astype(compute_dtype)       # (in_dim, 4H)
            whh = w_refs[3 * l + 1][...].astype(compute_dtype)   # (H, 4H)
            b = w_refs[3 * l + 2][...]                           # (1, 4H) = b_ih+b_hh
            # Hoisted whole-sequence input projection: ONE MXU pass per layer,
            # kept vreg-resident (no VMEM scratch round-trip).
            xp = jnp.dot(layer_in.astype(compute_dtype), wih,
                         preferred_element_type=jnp.float32) + b     # (TB, 4H) f32
            h = h0_ref[l]                                            # (B, H) f32
            c = c0_ref[l]                                            # (B, H) f32
            hs = []
            for t in range(T):                    # short fixed recurrence: unroll
                g = xp[t * B:(t + 1) * B, :] + jnp.dot(
                    h.astype(compute_dtype), whh,
                    preferred_element_type=jnp.float32)              # (B, 4H) f32
                i_g = sigmoid(g[:, 0:H])
                f_g = sigmoid(g[:, H:2 * H])
                g_g = jnp.tanh(g[:, 2 * H:3 * H])
                o_g = sigmoid(g[:, 3 * H:4 * H])
                c = f_g * c + i_g * g_g
                h = o_g * jnp.tanh(c)
                hs.append(h)
            hT_ref[l] = h
            cT_ref[l] = c
            # stack the per-step outputs once -> next layer / decoder input
            layer_in = jnp.concatenate(hs, axis=0)                   # (TB, H) f32

        # decoder: ONE lane-dense (TB, H) x (H, ntoken_pad) matmul + bias
        d_ref[...] = jnp.dot(layer_in.astype(compute_dtype),
                             wd_ref[...].astype(compute_dtype),
                             preferred_element_type=jnp.float32) + bd_ref[...]

    return kernel


# ------------------------------- wrapper ------------------------------------ #
def rnn_lm_forward(params, inputs, hidden, *, fast=False):
    """Forward of RNN_LM_original (rnn_type='LSTM', eval mode).

    fast=False: f32 matmul operands (matches the reference tightly).
    fast=True : bf16 matmul operands + approx-reciprocal sigmoid; f32 accumulation
                and gate math (validate with loose tolerances).
    """
    Eemb, layer_params, Wd, bd = params
    h0, c0 = hidden
    nlayers = len(layer_params)
    T, B = inputs.shape
    H = h0.shape[-1]
    ntoken = Wd.shape[0]
    compute_dtype = jnp.bfloat16 if fast else jnp.float32

    ids = inputs.reshape(T * B, 1).astype(jnp.int32)            # token ids -> VMEM
    embT = jnp.asarray(Eemb, jnp.float32).T                     # (ninp, ntoken)

    # transpose weights / fuse biases into the kernel's (row, col) layout
    flat_w = []
    for (Wih, Whh, bih, bhh) in layer_params:
        flat_w += [jnp.asarray(Wih, jnp.float32).T,
                   jnp.asarray(Whh, jnp.float32).T,
                   (bih + bhh).reshape(1, -1).astype(jnp.float32)]

    # lane-dense decoder output: pad ntoken up to a multiple of 128 with zeros
    ntoken_pad = ((ntoken + 127) // 128) * 128
    wd_pad = jnp.zeros((H, ntoken_pad), jnp.float32).at[:, :ntoken].set(
        jnp.asarray(Wd, jnp.float32).T)
    bd_pad = jnp.zeros((1, ntoken_pad), jnp.float32).at[:, :ntoken].set(
        jnp.asarray(bd, jnp.float32))

    vmem = pl.BlockSpec(memory_space=pltpu.MemorySpace.VMEM)
    n_in = 4 + 3 * nlayers + 2

    d_pad, hT, cT = pl.pallas_call(
        make_lstm_lm_kernel(nlayers, T, B, H, compute_dtype, approx_sigmoid=fast),
        out_shape=(jax.ShapeDtypeStruct((T * B, ntoken_pad), jnp.float32),
                   jax.ShapeDtypeStruct((nlayers, B, H), jnp.float32),
                   jax.ShapeDtypeStruct((nlayers, B, H), jnp.float32)),
        in_specs=[vmem] * n_in,
        out_specs=(vmem, vmem, vmem),
        # h0 -> hT, c0 -> cT reuse the hidden-state buffers (no extra writeback alloc)
        input_output_aliases={2: 1, 3: 2},
    )(ids, embT, h0, c0, *flat_w, wd_pad, bd_pad)

    d = d_pad[:, :ntoken].reshape(T, B, ntoken)                 # d.view(T, B, ntoken)
    return d, (hT, cT)


# ------------------------------ pure-jnp reference -------------------------- #
def rnn_lm_reference(params, inputs, hidden):
    Eemb, layer_params, Wd, bd = params
    h0, c0 = hidden
    T, B = inputs.shape
    x = Eemb[inputs]                                            # (T, B, ninp)
    hs, cs = [], []
    for l, (Wih, Whh, bih, bhh) in enumerate(layer_params):
        H = Whh.shape[1]
        h, c = h0[l], c0[l]
        outs = []
        for t in range(T):
            g = x[t] @ Wih.T + bih + h @ Whh.T + bhh
            i_g = _sigmoid_exact(g[:, 0:H])
            f_g = _sigmoid_exact(g[:, H:2 * H])
            g_g = jnp.tanh(g[:, 2 * H:3 * H])
            o_g = _sigmoid_exact(g[:, 3 * H:4 * H])
            c = f_g * c + i_g * g_g
            h = o_g * jnp.tanh(c)
            outs.append(h)
        x = jnp.stack(outs, axis=0)
        hs.append(h)
        cs.append(c)
    d = x.reshape(T * B, -1) @ Wd.T + bd
    return d.reshape(T, B, -1), (jnp.stack(hs, 0), jnp.stack(cs, 0))


# --------------------------------- main ------------------------------------- #
if __name__ == "__main__":
    # Module hyperparameters (small, consistent with the forward pass)
    ntoken, ninp, nhid, nlayers = 50, 16, 32, 2
    T, B = 8, 2                                   # (seq_len, batch), batch_first=False
    initrange = 0.1

    key = jax.random.PRNGKey(0)
    ks = iter(jax.random.split(key, 16))

    # init_weights(): encoder / decoder uniform(-0.1, 0.1), decoder bias zero
    Eemb = jax.random.uniform(next(ks), (ntoken, ninp),
                              minval=-initrange, maxval=initrange)
    layer_params = []
    for l in range(nlayers):
        in_dim = ninp if l == 0 else nhid
        s = 1.0 / np.sqrt(nhid)                   # PyTorch LSTM default init range
        Wih = jax.random.uniform(next(ks), (4 * nhid, in_dim), minval=-s, maxval=s)
        Whh = jax.random.uniform(next(ks), (4 * nhid, nhid), minval=-s, maxval=s)
        bih = jax.random.uniform(next(ks), (4 * nhid,), minval=-s, maxval=s)
        bhh = jax.random.uniform(next(ks), (4 * nhid,), minval=-s, maxval=s)
        layer_params.append((Wih, Whh, bih, bhh))
    Wd = jax.random.uniform(next(ks), (ntoken, nhid),
                            minval=-initrange, maxval=initrange)
    bd = jnp.zeros((ntoken,), jnp.float32)
    params = (Eemb, layer_params, Wd, bd)

    # deterministic token inputs + init_hidden(bsz) zeros
    inputs = jax.random.randint(next(ks), (T, B), 0, ntoken)

    def make_hidden():
        return (jnp.zeros((nlayers, B, nhid), jnp.float32),
                jnp.zeros((nlayers, B, nhid), jnp.float32))

    # pure-jnp reference
    d_ref, (h_ref, c_ref) = rnn_lm_reference(params, inputs, make_hidden())

    # f32 kernel path (tight check)
    d, (hT, cT) = rnn_lm_forward(params, inputs, make_hidden())
    d = jax.block_until_ready(d)
    assert d.shape == (T, B, ntoken)
    assert hT.shape == (nlayers, B, nhid) and cT.shape == (nlayers, B, nhid)
    assert np.allclose(np.asarray(d), np.asarray(d_ref), atol=1e-5, rtol=1e-4)
    assert np.allclose(np.asarray(hT), np.asarray(h_ref), atol=1e-5, rtol=1e-4)
    assert np.allclose(np.asarray(cT), np.asarray(c_ref), atol=1e-5, rtol=1e-4)

    # bf16-operand fast path (sanity check with loose tolerances)
    d_f, (hT_f, cT_f) = rnn_lm_forward(params, inputs, make_hidden(), fast=True)
    d_f = jax.block_until_ready(d_f)
    assert np.allclose(np.asarray(d_f), np.asarray(d_ref), atol=1e-1, rtol=1e-1)
    assert np.allclose(np.asarray(hT_f), np.asarray(h_ref), atol=1e-1, rtol=1e-1)
    assert np.allclose(np.asarray(cT_f), np.asarray(c_ref), atol=1e-1, rtol=1e-1)

    print("KERNEL_OK")
</pallas_src>

<mosaic_0001>
module attributes {stable_mosaic.version = 11 : i64} {
  func.func @kernel(%arg0: memref<16x1xi32, #tpu.memory_space<vmem>>, %arg1: memref<16x50xf32, #tpu.memory_space<vmem>>, %arg2: memref<2x2x32xf32, #tpu.memory_space<vmem>>, %arg3: memref<2x2x32xf32, #tpu.memory_space<vmem>>, %arg4: memref<16x128xf32, #tpu.memory_space<vmem>>, %arg5: memref<32x128xf32, #tpu.memory_space<vmem>>, %arg6: memref<1x128xf32, #tpu.memory_space<vmem>>, %arg7: memref<32x128xf32, #tpu.memory_space<vmem>>, %arg8: memref<32x128xf32, #tpu.memory_space<vmem>>, %arg9: memref<1x128xf32, #tpu.memory_space<vmem>>, %arg10: memref<32x128xf32, #tpu.memory_space<vmem>>, %arg11: memref<1x128xf32, #tpu.memory_space<vmem>>, %arg12: memref<16x128xf32, #tpu.memory_space<vmem>>, %arg13: memref<2x2x32xf32, #tpu.memory_space<vmem>>, %arg14: memref<2x2x32xf32, #tpu.memory_space<vmem>>) attributes {dimension_semantics = [], scalar_prefetch = 0 : i64, scratch_operands = 0 : i64, tpu.core_type = #tpu.core_type<tc>} {
    %c0 = arith.constant 0 : index
    %c0_0 = arith.constant 0 : index
    %0 = vector.load %arg0[%c0, %c0_0] : memref<16x1xi32, #tpu.memory_space<vmem>>, vector<16x1xi32>
    %1 = tpu.iota {dimensions = array<i32: 1>} : vector<16x50xi32>
    %2 = vector.broadcast %0 : vector<16x1xi32> to vector<16x50xi32>
    %3 = arith.cmpi eq, %1, %2 : vector<16x50xi32>
    %c0_1 = arith.constant 0 : index
    %c0_2 = arith.constant 0 : index
    %4 = vector.load %arg1[%c0_1, %c0_2] : memref<16x50xf32, #tpu.memory_space<vmem>>, vector<16x50xf32>
    %5 = vector.shape_cast %3 : vector<16x50xi1> to vector<16x1x50xi1>
    %6 = arith.extui %5 : vector<16x1x50xi1> to vector<16x1x50xi32>
    %7 = arith.sitofp %6 : vector<16x1x50xi32> to vector<16x1x50xf32>
    %8 = vector.shape_cast %4 : vector<16x50xf32> to vector<1x16x50xf32>
    %9 = vector.broadcast %7 : vector<16x1x50xf32> to vector<16x16x50xf32>
    %10 = vector.broadcast %8 : vector<1x16x50xf32> to vector<16x16x50xf32>
    %11 = arith.mulf %9, %10 : vector<16x16x50xf32>
    %cst = arith.constant dense<0.000000e+00> : vector<16x16xf32>
    %12 = vector.multi_reduction <add>, %11, %cst [2] : vector<16x16x50xf32> to vector<16x16xf32>
    %c0_3 = arith.constant 0 : index
    %c0_4 = arith.constant 0 : index
    %13 = vector.load %arg4[%c0_3, %c0_4] : memref<16x128xf32, #tpu.memory_space<vmem>>, vector<16x128xf32>
    %c0_5 = arith.constant 0 : index
    %c0_6 = arith.constant 0 : index
    %14 = vector.load %arg5[%c0_5, %c0_6] : memref<32x128xf32, #tpu.memory_space<vmem>>, vector<32x128xf32>
    %c0_7 = arith.constant 0 : index
    %c0_8 = arith.constant 0 : index
    %15 = vector.load %arg6[%c0_7, %c0_8] : memref<1x128xf32, #tpu.memory_space<vmem>>, vector<1x128xf32>
    %cst_9 = arith.constant dense<0.000000e+00> : vector<16x128xf32>
    %16 = tpu.matmul %12, %13, %cst_9 {dimension_numbers = #tpu.dot_dimension_numbers<[1], [0], [0], [1], [0, 0, 1, 1], [], []>} : vector<16x16xf32>, vector<16x128xf32>, vector<16x128xf32> -> vector<16x128xf32>
    %17 = vector.broadcast %15 : vector<1x128xf32> to vector<16x128xf32>
    %18 = arith.addf %16, %17 : vector<16x128xf32>
    %c0_10 = arith.constant 0 : index
    %c0_11 = arith.constant 0 : index
    %c0_12 = arith.constant 0 : index
    %19 = vector.load %arg2[%c0_10, %c0_11, %c0_12] : memref<2x2x32xf32, #tpu.memory_space<vmem>>, vector<1x2x32xf32>
    %20 = vector.shape_cast %19 : vector<1x2x32xf32> to vector<2x32xf32>
    %c0_13 = arith.constant 0 : index
    %c0_14 = arith.constant 0 : index
    %c0_15 = arith.constant 0 : index
    %21 = vector.load %arg3[%c0_13, %c0_14, %c0_15] : memref<2x2x32xf32, #tpu.memory_space<vmem>>, vector<1x2x32xf32>
    %22 = vector.shape_cast %21 : vector<1x2x32xf32> to vector<2x32xf32>
    %23 = vector.extract_strided_slice %18 {offsets = [0, 0], sizes = [2, 128], strides = [1, 1]} : vector<16x128xf32> to vector<2x128xf32>
    %cst_16 = arith.constant dense<0.000000e+00> : vector<2x128xf32>
    %24 = tpu.matmul %20, %14, %cst_16 {dimension_numbers = #tpu.dot_dimension_numbers<[1], [0], [0], [1], [0, 0, 1, 1], [], []>} : vector<2x32xf32>, vector<32x128xf32>, vector<2x128xf32> -> vector<2x128xf32>
    %25 = arith.addf %23, %24 : vector<2x128xf32>
    %26 = vector.extract_strided_slice %25 {offsets = [0, 0], sizes = [2, 32], strides = [1, 1]} : vector<2x128xf32> to vector<2x32xf32>
    %cst_17 = arith.constant 0.000000e+00 : f32
    %27 = vector.broadcast %cst_17 : f32 to vector<2x32xf32>
    %28 = arith.subf %27, %26 : vector<2x32xf32>
    %29 = math.exp %28 : vector<2x32xf32>
    %cst_18 = arith.constant 1.000000e+00 : f32
    %30 = vector.broadcast %cst_18 : f32 to vector<2x32xf32>
    %31 = arith.addf %30, %29 : vector<2x32xf32>
    %cst_19 = arith.constant 1.000000e+00 : f32
    %32 = vector.broadcast %cst_19 : f32 to vector<2x32xf32>
    %33 = arith.divf %32, %31 : vector<2x32xf32>
    %34 = vector.extract_strided_slice %25 {offsets = [0, 32], sizes = [2, 32], strides = [1, 1]} : vector<2x128xf32> to vector<2x32xf32>
    %cst_20 = arith.constant 0.000000e+00 : f32
    %35 = vector.broadcast %cst_20 : f32 to vector<2x32xf32>
    %36 = arith.subf %35, %34 : vector<2x32xf32>
    %37 = math.exp %36 : vector<2x32xf32>
    %cst_21 = arith.constant 1.000000e+00 : f32
    %38 = vector.broadcast %cst_21 : f32 to vector<2x32xf32>
    %39 = arith.addf %38, %37 : vector<2x32xf32>
    %cst_22 = arith.constant 1.000000e+00 : f32
    %40 = vector.broadcast %cst_22 : f32 to vector<2x32xf32>
    %41 = arith.divf %40, %39 : vector<2x32xf32>
    %42 = vector.extract_strided_slice %25 {offsets = [0, 64], sizes = [2, 32], strides = [1, 1]} : vector<2x128xf32> to vector<2x32xf32>
    %43 = math.tanh %42 : vector<2x32xf32>
    %44 = vector.extract_strided_slice %25 {offsets = [0, 96], sizes = [2, 32], strides = [1, 1]} : vector<2x128xf32> to vector<2x32xf32>
    %cst_23 = arith.constant 0.000000e+00 : f32
    %45 = vector.broadcast %cst_23 : f32 to vector<2x32xf32>
    %46 = arith.subf %45, %44 : vector<2x32xf32>
    %47 = math.exp %46 : vector<2x32xf32>
    %cst_24 = arith.constant 1.000000e+00 : f32
    %48 = vector.broadcast %cst_24 : f32 to vector<2x32xf32>
    %49 = arith.addf %48, %47 : vector<2x32xf32>
    %cst_25 = arith.constant 1.000000e+00 : f32
    %50 = vector.broadcast %cst_25 : f32 to vector<2x32xf32>
    %51 = arith.divf %50, %49 : vector<2x32xf32>
    %52 = arith.mulf %41, %22 : vector<2x32xf32>
    %53 = arith.mulf %33, %43 : vector<2x32xf32>
    %54 = arith.addf %52, %53 : vector<2x32xf32>
    %55 = math.tanh %54 : vector<2x32xf32>
    %56 = arith.mulf %51, %55 : vector<2x32xf32>
    %57 = vector.extract_strided_slice %18 {offsets = [2, 0], sizes = [2, 128], strides = [1, 1]} : vector<16x128xf32> to vector<2x128xf32>
    %cst_26 = arith.constant dense<0.000000e+00> : vector<2x128xf32>
    %58 = tpu.matmul %56, %14, %cst_26 {dimension_numbers = #tpu.dot_dimension_numbers<[1], [0], [0], [1], [0, 0, 1, 1], [], []>} : vector<2x32xf32>, vector<32x128xf32>, vector<2x128xf32> -> vector<2x128xf32>
    %59 = arith.addf %57, %58 : vector<2x128xf32>
    %60 = vector.extract_strided_slice %59 {offsets = [0, 0], sizes = [2, 32], strides = [1, 1]} : vector<2x128xf32> to vector<2x32xf32>
    %cst_27 = arith.constant 0.000000e+00 : f32
    %61 = vector.broadcast %cst_27 : f32 to vector<2x32xf32>
    %62 = arith.subf %61, %60 : vector<2x32xf32>
    %63 = math.exp %62 : vector<2x32xf32>
    %cst_28 = arith.constant 1.000000e+00 : f32
    %64 = vector.broadcast %cst_28 : f32 to vector<2x32xf32>
    %65 = arith.addf %64, %63 : vector<2x32xf32>
    %cst_29 = arith.constant 1.000000e+00 : f32
    %66 = vector.broadcast %cst_29 : f32 to vector<2x32xf32>
    %67 = arith.divf %66, %65 : vector<2x32xf32>
    %68 = vector.extract_strided_slice %59 {offsets = [0, 32], sizes = [2, 32], strides = [1, 1]} : vector<2x128xf32> to vector<2x32xf32>
    %cst_30 = arith.constant 0.000000e+00 : f32
    %69 = vector.broadcast %cst_30 : f32 to vector<2x32xf32>
    %70 = arith.subf %69, %68 : vector<2x32xf32>
    %71 = math.exp %70 : vector<2x32xf32>
    %cst_31 = arith.constant 1.000000e+00 : f32
    %72 = vector.broadcast %cst_31 : f32 to vector<2x32xf32>
    %73 = arith.addf %72, %71 : vector<2x32xf32>
    %cst_32 = arith.constant 1.000000e+00 : f32
    %74 = vector.broadcast %cst_32 : f32 to vector<2x32xf32>
    %75 = arith.divf %74, %73 : vector<2x32xf32>
    %76 = vector.extract_strided_slice %59 {offsets = [0, 64], sizes = [2, 32], strides = [1, 1]} : vector<2x128xf32> to vector<2x32xf32>
    %77 = math.tanh %76 : vector<2x32xf32>
    %78 = vector.extract_strided_slice %59 {offsets = [0, 96], sizes = [2, 32], strides = [1, 1]} : vector<2x128xf32> to vector<2x32xf32>
    %cst_33 = arith.constant 0.000000e+00 : f32
    %79 = vector.broadcast %cst_33 : f32 to vector<2x32xf32>
    %80 = arith.subf %79, %78 : vector<2x32xf32>
    %81 = math.exp %80 : vector<2x32xf32>
    %cst_34 = arith.constant 1.000000e+00 : f32
    %82 = vector.broadcast %cst_34 : f32 to vector<2x32xf32>
    %83 = arith.addf %82, %81 : vector<2x32xf32>
    %cst_35 = arith.constant 1.000000e+00 : f32
    %84 = vector.broadcast %cst_35 : f32 to vector<2x32xf32>
    %85 = arith.divf %84, %83 : vector<2x32xf32>
    %86 = arith.mulf %75, %54 : vector<2x32xf32>
    %87 = arith.mulf %67, %77 : vector<2x32xf32>
    %88 = arith.addf %86, %87 : vector<2x32xf32>
    %89 = math.tanh %88 : vector<2x32xf32>
    %90 = arith.mulf %85, %89 : vector<2x32xf32>
    %91 = vector.extract_strided_slice %18 {offsets = [4, 0], sizes = [2, 128], strides = [1, 1]} : vector<16x128xf32> to vector<2x128xf32>
    %cst_36 = arith.constant dense<0.000000e+00> : vector<2x128xf32>
    %92 = tpu.matmul %90, %14, %cst_36 {dimension_numbers = #tpu.dot_dimension_numbers<[1], [0], [0], [1], [0, 0, 1, 1], [], []>} : vector<2x32xf32>, vector<32x128xf32>, vector<2x128xf32> -> vector<2x128xf32>
    %93 = arith.addf %91, %92 : vector<2x128xf32>
    %94 = vector.extract_strided_slice %93 {offsets = [0, 0], sizes = [2, 32], strides = [1, 1]} : vector<2x128xf32> to vector<2x32xf32>
    %cst_37 = arith.constant 0.000000e+00 : f32
    %95 = vector.broadcast %cst_37 : f32 to vector<2x32xf32>
    %96 = arith.subf %95, %94 : vector<2x32xf32>
    %97 = math.exp %96 : vector<2x32xf32>
    %cst_38 = arith.constant 1.000000e+00 : f32
    %98 = vector.broadcast %cst_38 : f32 to vector<2x32xf32>
    %99 = arith.addf %98, %97 : vector<2x32xf32>
    %cst_39 = arith.constant 1.000000e+00 : f32
    %100 = vector.broadcast %cst_39 : f32 to vector<2x32xf32>
    %101 = arith.divf %100, %99 : vector<2x32xf32>
    %102 = vector.extract_strided_slice %93 {offsets = [0, 32], sizes = [2, 32], strides = [1, 1]} : vector<2x128xf32> to vector<2x32xf32>
    %cst_40 = arith.constant 0.000000e+00 : f32
    %103 = vector.broadcast %cst_40 : f32 to vector<2x32xf32>
    %104 = arith.subf %103, %102 : vector<2x32xf32>
    %105 = math.exp %104 : vector<2x32xf32>
    %cst_41 = arith.constant 1.000000e+00 : f32
    %106 = vector.broadcast %cst_41 : f32 to vector<2x32xf32>
    %107 = arith.addf %106, %105 : vector<2x32xf32>
    %cst_42 = arith.constant 1.000000e+00 : f32
    %108 = vector.broadcast %cst_42 : f32 to vector<2x32xf32>
    %109 = arith.divf %108, %107 : vector<2x32xf32>
    %110 = vector.extract_strided_slice %93 {offsets = [0, 64], sizes = [2, 32], strides = [1, 1]} : vector<2x128xf32> to vector<2x32xf32>
    %111 = math.tanh %110 : vector<2x32xf32>
    %112 = vector.extract_strided_slice %93 {offsets = [0, 96], sizes = [2, 32], strides = [1, 1]} : vector<2x128xf32> to vector<2x32xf32>
    %cst_43 = arith.constant 0.000000e+00 : f32
    %113 = vector.broadcast %cst_43 : f32 to vector<2x32xf32>
    %114 = arith.subf %113, %112 : vector<2x32xf32>
    %115 = math.exp %114 : vector<2x32xf32>
    %cst_44 = arith.constant 1.000000e+00 : f32
    %116 = vector.broadcast %cst_44 : f32 to vector<2x32xf32>
    %117 = arith.addf %116, %115 : vector<2x32xf32>
    %cst_45 = arith.constant 1.000000e+00 : f32
    %118 = vector.broadcast %cst_45 : f32 to vector<2x32xf32>
    %119 = arith.divf %118, %117 : vector<2x32xf32>
    %120 = arith.mulf %109, %88 : vector<2x32xf32>
    %121 = arith.mulf %101, %111 : vector<2x32xf32>
    %122 = arith.addf %120, %121 : vector<2x32xf32>
    %123 = math.tanh %122 : vector<2x32xf32>
    %124 = arith.mulf %119, %123 : vector<2x32xf32>
    %125 = vector.extract_strided_slice %18 {offsets = [6, 0], sizes = [2, 128], strides = [1, 1]} : vector<16x128xf32> to vector<2x128xf32>
    %cst_46 = arith.constant dense<0.000000e+00> : vector<2x128xf32>
    %126 = tpu.matmul %124, %14, %cst_46 {dimension_numbers = #tpu.dot_dimension_numbers<[1], [0], [0], [1], [0, 0, 1, 1], [], []>} : vector<2x32xf32>, vector<32x128xf32>, vector<2x128xf32> -> vector<2x128xf32>
    %127 = arith.addf %125, %126 : vector<2x128xf32>
    %128 = vector.extract_strided_slice %127 {offsets = [0, 0], sizes = [2, 32], strides = [1, 1]} : vector<2x128xf32> to vector<2x32xf32>
    %cst_47 = arith.constant 0.000000e+00 : f32
    %129 = vector.broadcast %cst_47 : f32 to vector<2x32xf32>
    %130 = arith.subf %129, %128 : vector<2x32xf32>
    %131 = math.exp %130 : vector<2x32xf32>
    %cst_48 = arith.constant 1.000000e+00 : f32
    %132 = vector.broadcast %cst_48 : f32 to vector<2x32xf32>
    %133 = arith.addf %132, %131 : vector<2x32xf32>
    %cst_49 = arith.constant 1.000000e+00 : f32
    %134 = vector.broadcast %cst_49 : f32 to vector<2x32xf32>
    %135 = arith.divf %134, %133 : vector<2x32xf32>
    %136 = vector.extract_strided_slice %127 {offsets = [0, 32], sizes = [2, 32], strides = [1, 1]} : vector<2x128xf32> to vector<2x32xf32>
    %cst_50 = arith.constant 0.000000e+00 : f32
    %137 = vector.broadcast %cst_50 : f32 to vector<2x32xf32>
    %138 = arith.subf %137, %136 : vector<2x32xf32>
    %139 = math.exp %138 : vector<2x32xf32>
    %cst_51 = arith.constant 1.000000e+00 : f32
    %140 = vector.broadcast %cst_51 : f32 to vector<2x32xf32>
    %141 = arith.addf %140, %139 : vector<2x32xf32>
    %cst_52 = arith.constant 1.000000e+00 : f32
    %142 = vector.broadcast %cst_52 : f32 to vector<2x32xf32>
    %143 = arith.divf %142, %141 : vector<2x32xf32>
    %144 = vector.extract_strided_slice %127 {offsets = [0, 64], sizes = [2, 32], strides = [1, 1]} : vector<2x128xf32> to vector<2x32xf32>
    %145 = math.tanh %144 : vector<2x32xf32>
    %146 = vector.extract_strided_slice %127 {offsets = [0, 96], sizes = [2, 32], strides = [1, 1]} : vector<2x128xf32> to vector<2x32xf32>
    %cst_53 = arith.constant 0.000000e+00 : f32
    %147 = vector.broadcast %cst_53 : f32 to vector<2x32xf32>
    %148 = arith.subf %147, %146 : vector<2x32xf32>
    %149 = math.exp %148 : vector<2x32xf32>
    %cst_54 = arith.constant 1.000000e+00 : f32
    %150 = vector.broadcast %cst_54 : f32 to vector<2x32xf32>
    %151 = arith.addf %150, %149 : vector<2x32xf32>
    %cst_55 = arith.constant 1.000000e+00 : f32
    %152 = vector.broadcast %cst_55 : f32 to vector<2x32xf32>
    %153 = arith.divf %152, %151 : vector<2x32xf32>
    %154 = arith.mulf %143, %122 : vector<2x32xf32>
    %155 = arith.mulf %135, %145 : vector<2x32xf32>
    %156 = arith.addf %154, %155 : vector<2x32xf32>
    %157 = math.tanh %156 : vector<2x32xf32>
    %158 = arith.mulf %153, %157 : vector<2x32xf32>
    %159 = vector.extract_strided_slice %18 {offsets = [8, 0], sizes = [2, 128], strides = [1, 1]} : vector<16x128xf32> to vector<2x128xf32>
    %cst_56 = arith.constant dense<0.000000e+00> : vector<2x128xf32>
    %160 = tpu.matmul %158, %14, %cst_56 {dimension_numbers = #tpu.dot_dimension_numbers<[1], [0], [0], [1], [0, 0, 1, 1], [], []>} : vector<2x32xf32>, vector<32x128xf32>, vector<2x128xf32> -> vector<2x128xf32>
    %161 = arith.addf %159, %160 : vector<2x128xf32>
    %162 = vector.extract_strided_slice %161 {offsets = [0, 0], sizes = [2, 32], strides = [1, 1]} : vector<2x128xf32> to vector<2x32xf32>
    %cst_57 = arith.constant 0.000000e+00 : f32
    %163 = vector.broadcast %cst_57 : f32 to vector<2x32xf32>
    %164 = arith.subf %163, %162 : vector<2x32xf32>
    %165 = math.exp %164 : vector<2x32xf32>
    %cst_58 = arith.constant 1.000000e+00 : f32
    %166 = vector.broadcast %cst_58 : f32 to vector<2x32xf32>
    %167 = arith.addf %166, %165 : vector<2x32xf32>
    %cst_59 = arith.constant 1.000000e+00 : f32
    %168 = vector.broadcast %cst_59 : f32 to vector<2x32xf32>
    %169 = arith.divf %168, %167 : vector<2x32xf32>
    %170 = vector.extract_strided_slice %161 {offsets = [0, 32], sizes = [2, 32], strides = [1, 1]} : vector<2x128xf32> to vector<2x32xf32>
    %cst_60 = arith.constant 0.000000e+00 : f32
    %171 = vector.broadcast %cst_60 : f32 to vector<2x32xf32>
    %172 = arith.subf %171, %170 : vector<2x32xf32>
    %173 = math.exp %172 : vector<2x32xf32>
    %cst_61 = arith.constant 1.000000e+00 : f32
    %174 = vector.broadcast %cst_61 : f32 to vector<2x32xf32>
    %175 = arith.addf %174, %173 : vector<2x32xf32>
    %cst_62 = arith.constant 1.000000e+00 : f32
    %176 = vector.broadcast %cst_62 : f32 to vector<2x32xf32>
    %177 = arith.divf %176, %175 : vector<2x32xf32>
    %178 = vector.extract_strided_slice %161 {offsets = [0, 64], sizes = [2, 32], strides = [1, 1]} : vector<2x128xf32> to vector<2x32xf32>
    %179 = math.tanh %178 : vector<2x32xf32>
    %180 = vector.extract_strided_slice %161 {offsets = [0, 96], sizes = [2, 32], strides = [1, 1]} : vector<2x128xf32> to vector<2x32xf32>
    %cst_63 = arith.constant 0.000000e+00 : f32
    %181 = vector.broadcast %cst_63 : f32 to vector<2x32xf32>
    %182 = arith.subf %181, %180 : vector<2x32xf32>
    %183 = math.exp %182 : vector<2x32xf32>
    %cst_64 = arith.constant 1.000000e+00 : f32
    %184 = vector.broadcast %cst_64 : f32 to vector<2x32xf32>
    %185 = arith.addf %184, %183 : vector<2x32xf32>
    %cst_65 = arith.constant 1.000000e+00 : f32
    %186 = vector.broadcast %cst_65 : f32 to vector<2x32xf32>
    %187 = arith.divf %186, %185 : vector<2x32xf32>
    %188 = arith.mulf %177, %156 : vector<2x32xf32>
    %189 = arith.mulf %169, %179 : vector<2x32xf32>
    %190 = arith.addf %188, %189 : vector<2x32xf32>
    %191 = math.tanh %190 : vector<2x32xf32>
    %192 = arith.mulf %187, %191 : vector<2x32xf32>
    %193 = vector.extract_strided_slice %18 {offsets = [10, 0], sizes = [2, 128], strides = [1, 1]} : vector<16x128xf32> to vector<2x128xf32>
    %cst_66 = arith.constant dense<0.000000e+00> : vector<2x128xf32>
    %194 = tpu.matmul %192, %14, %cst_66 {dimension_numbers = #tpu.dot_dimension_numbers<[1], [0], [0], [1], [0, 0, 1, 1], [], []>} : vector<2x32xf32>, vector<32x128xf32>, vector<2x128xf32> -> vector<2x128xf32>
    %195 = arith.addf %193, %194 : vector<2x128xf32>
    %196 = vector.extract_strided_slice %195 {offsets = [0, 0], sizes = [2, 32], strides = [1, 1]} : vector<2x128xf32> to vector<2x32xf32>
    %cst_67 = arith.constant 0.000000e+00 : f32
    %197 = vector.broadcast %cst_67 : f32 to vector<2x32xf32>
    %198 = arith.subf %197, %196 : vector<2x32xf32>
    %199 = math.exp %198 : vector<2x32xf32>
    %cst_68 = arith.constant 1.000000e+00 : f32
    %200 = vector.broadcast %cst_68 : f32 to vector<2x32xf32>
    %201 = arith.addf %200, %199 : vector<2x32xf32>
    %cst_69 = arith.constant 1.000000e+00 : f32
    %202 = vector.broadcast %cst_69 : f32 to vector<2x32xf32>
    %203 = arith.divf %202, %201 : vector<2x32xf32>
    %204 = vector.extract_strided_slice %195 {offsets = [0, 32], sizes = [2, 32], strides = [1, 1]} : vector<2x128xf32> to vector<2x32xf32>
    %cst_70 = arith.constant 0.000000e+00 : f32
    %205 = vector.broadcast %cst_70 : f32 to vector<2x32xf32>
    %206 = arith.subf %205, %204 : vector<2x32xf32>
    %207 = math.exp %206 : vector<2x32xf32>
    %cst_71 = arith.constant 1.000000e+00 : f32
    %208 = vector.broadcast %cst_71 : f32 to vector<2x32xf32>
    %209 = arith.addf %208, %207 : vector<2x32xf32>
    %cst_72 = arith.constant 1.000000e+00 : f32
    %210 = vector.broadcast %cst_72 : f32 to vector<2x32xf32>
    %211 = arith.divf %210, %209 : vector<2x32xf32>
    %212 = vector.extract_strided_slice %195 {offsets = [0, 64], sizes = [2, 32], strides = [1, 1]} : vector<2x128xf32> to vector<2x32xf32>
    %213 = math.tanh %212 : vector<2x32xf32>
    %214 = vector.extract_strided_slice %195 {offsets = [0, 96], sizes = [2, 32], strides = [1, 1]} : vector<2x128xf32> to vector<2x32xf32>
    %cst_73 = arith.constant 0.000000e+00 : f32
    %215 = vector.broadcast %cst_73 : f32 to vector<2x32xf32>
    %216 = arith.subf %215, %214 : vector<2x32xf32>
    %217 = math.exp %216 : vector<2x32xf32>
    %cst_74 = arith.constant 1.000000e+00 : f32
    %218 = vector.broadcast %cst_74 : f32 to vector<2x32xf32>
    %219 = arith.addf %218, %217 : vector<2x32xf32>
    %cst_75 = arith.constant 1.000000e+00 : f32
    %220 = vector.broadcast %cst_75 : f32 to vector<2x32xf32>
    %221 = arith.divf %220, %219 : vector<2x32xf32>
    %222 = arith.mulf %211, %190 : vector<2x32xf32>
    %223 = arith.mulf %203, %213 : vector<2x32xf32>
    %224 = arith.addf %222, %223 : vector<2x32xf32>
    %225 = math.tanh %224 : vector<2x32xf32>
    %226 = arith.mulf %221, %225 : vector<2x32xf32>
    %227 = vector.extract_strided_slice %18 {offsets = [12, 0], sizes = [2, 128], strides = [1, 1]} : vector<16x128xf32> to vector<2x128xf32>
    %cst_76 = arith.constant dense<0.000000e+00> : vector<2x128xf32>
    %228 = tpu.matmul %226, %14, %cst_76 {dimension_numbers = #tpu.dot_dimension_numbers<[1], [0], [0], [1], [0, 0, 1, 1], [], []>} : vector<2x32xf32>, vector<32x128xf32>, vector<2x128xf32> -> vector<2x128xf32>
    %229 = arith.addf %227, %228 : vector<2x128xf32>
    %230 = vector.extract_strided_slice %229 {offsets = [0, 0], sizes = [2, 32], strides = [1, 1]} : vector<2x128xf32> to vector<2x32xf32>
    %cst_77 = arith.constant 0.000000e+00 : f32
    %231 = vector.broadcast %cst_77 : f32 to vector<2x32xf32>
    %232 = arith.subf %231, %230 : vector<2x32xf32>
    %233 = math.exp %232 : vector<2x32xf32>
    %cst_78 = arith.constant 1.000000e+00 : f32
    %234 = vector.broadcast %cst_78 : f32 to vector<2x32xf32>
    %235 = arith.addf %234, %233 : vector<2x32xf32>
    %cst_79 = arith.constant 1.000000e+00 : f32
    %236 = vector.broadcast %cst_79 : f32 to vector<2x32xf32>
    %237 = arith.divf %236, %235 : vector<2x32xf32>
    %238 = vector.extract_strided_slice %229 {offsets = [0, 32], sizes = [2, 32], strides = [1, 1]} : vector<2x128xf32> to vector<2x32xf32>
    %cst_80 = arith.constant 0.000000e+00 : f32
    %239 = vector.broadcast %cst_80 : f32 to vector<2x32xf32>
    %240 = arith.subf %239, %238 : vector<2x32xf32>
    %241 = math.exp %240 : vector<2x32xf32>
    %cst_81 = arith.constant 1.000000e+00 : f32
    %242 = vector.broadcast %cst_81 : f32 to vector<2x32xf32>
    %243 = arith.addf %242, %241 : vector<2x32xf32>
    %cst_82 = arith.constant 1.000000e+00 : f32
    %244 = vector.broadcast %cst_82 : f32 to vector<2x32xf32>
    %245 = arith.divf %244, %243 : vector<2x32xf32>
    %246 = vector.extract_strided_slice %229 {offsets = [0, 64], sizes = [2, 32], strides = [1, 1]} : vector<2x128xf32> to vector<2x32xf32>
    %247 = math.tanh %246 : vector<2x32xf32>
    %248 = vector.extract_strided_slice %229 {offsets = [0, 96], sizes = [2, 32], strides = [1, 1]} : vector<2x128xf32> to vector<2x32xf32>
    %cst_83 = arith.constant 0.000000e+00 : f32
    %249 = vector.broadcast %cst_83 : f32 to vector<2x32xf32>
    %250 = arith.subf %249, %248 : vector<2x32xf32>
    %251 = math.exp %250 : vector<2x32xf32>
    %cst_84 = arith.constant 1.000000e+00 : f32
    %252 = vector.broadcast %cst_84 : f32 to vector<2x32xf32>
    %253 = arith.addf %252, %251 : vector<2x32xf32>
    %cst_85 = arith.constant 1.000000e+00 : f32
    %254 = vector.broadcast %cst_85 : f32 to vector<2x32xf32>
    %255 = arith.divf %254, %253 : vector<2x32xf32>
    %256 = arith.mulf %245, %224 : vector<2x32xf32>
    %257 = arith.mulf %237, %247 : vector<2x32xf32>
    %258 = arith.addf %256, %257 : vector<2x32xf32>
    %259 = math.tanh %258 : vector<2x32xf32>
    %260 = arith.mulf %255, %259 : vector<2x32xf32>
    %261 = vector.extract_strided_slice %18 {offsets = [14, 0], sizes = [2, 128], strides = [1, 1]} : vector<16x128xf32> to vector<2x128xf32>
    %cst_86 = arith.constant dense<0.000000e+00> : vector<2x128xf32>
    %262 = tpu.matmul %260, %14, %cst_86 {dimension_numbers = #tpu.dot_dimension_numbers<[1], [0], [0], [1], [0, 0, 1, 1], [], []>} : vector<2x32xf32>, vector<32x128xf32>, vector<2x128xf32> -> vector<2x128xf32>
    %263 = arith.addf %261, %262 : vector<2x128xf32>
    %264 = vector.extract_strided_slice %263 {offsets = [0, 0], sizes = [2, 32], strides = [1, 1]} : vector<2x128xf32> to vector<2x32xf32>
    %cst_87 = arith.constant 0.000000e+00 : f32
    %265 = vector.broadcast %cst_87 : f32 to vector<2x32xf32>
    %266 = arith.subf %265, %264 : vector<2x32xf32>
    %267 = math.exp %266 : vector<2x32xf32>
    %cst_88 = arith.constant 1.000000e+00 : f32
    %268 = vector.broadcast %cst_88 : f32 to vector<2x32xf32>
    %269 = arith.addf %268, %267 : vector<2x32xf32>
    %cst_89 = arith.constant 1.000000e+00 : f32
    %270 = vector.broadcast %cst_89 : f32 to vector<2x32xf32>
    %271 = arith.divf %270, %269 : vector<2x32xf32>
    %272 = vector.extract_strided_slice %263 {offsets = [0, 32], sizes = [2, 32], strides = [1, 1]} : vector<2x128xf32> to vector<2x32xf32>
    %cst_90 = arith.constant 0.000000e+00 : f32
    %273 = vector.broadcast %cst_90 : f32 to vector<2x32xf32>
    %274 = arith.subf %273, %272 : vector<2x32xf32>
    %275 = math.exp %274 : vector<2x32xf32>
    %cst_91 = arith.constant 1.000000e+00 : f32
    %276 = vector.broadcast %cst_91 : f32 to vector<2x32xf32>
    %277 = arith.addf %276, %275 : vector<2x32xf32>
    %cst_92 = arith.constant 1.000000e+00 : f32
    %278 = vector.broadcast %cst_92 : f32 to vector<2x32xf32>
    %279 = arith.divf %278, %277 : vector<2x32xf32>
    %280 = vector.extract_strided_slice %263 {offsets = [0, 64], sizes = [2, 32], strides = [1, 1]} : vector<2x128xf32> to vector<2x32xf32>
    %281 = math.tanh %280 : vector<2x32xf32>
    %282 = vector.extract_strided_slice %263 {offsets = [0, 96], sizes = [2, 32], strides = [1, 1]} : vector<2x128xf32> to vector<2x32xf32>
    %cst_93 = arith.constant 0.000000e+00 : f32
    %283 = vector.broadcast %cst_93 : f32 to vector<2x32xf32>
    %284 = arith.subf %283, %282 : vector<2x32xf32>
    %285 = math.exp %284 : vector<2x32xf32>
    %cst_94 = arith.constant 1.000000e+00 : f32
    %286 = vector.broadcast %cst_94 : f32 to vector<2x32xf32>
    %287 = arith.addf %286, %285 : vector<2x32xf32>
    %cst_95 = arith.constant 1.000000e+00 : f32
    %288 = vector.broadcast %cst_95 : f32 to vector<2x32xf32>
    %289 = arith.divf %288, %287 : vector<2x32xf32>
    %290 = arith.mulf %279, %258 : vector<2x32xf32>
    %291 = arith.mulf %271, %281 : vector<2x32xf32>
    %292 = arith.addf %290, %291 : vector<2x32xf32>
    %293 = math.tanh %292 : vector<2x32xf32>
    %294 = arith.mulf %289, %293 : vector<2x32xf32>
    %c0_96 = arith.constant 0 : index
    %c0_97 = arith.constant 0 : index
    %c0_98 = arith.constant 0 : index
    %295 = vector.load %arg13[%c0_96, %c0_97, %c0_98] : memref<2x2x32xf32, #tpu.memory_space<vmem>>, vector<1x2x32xf32>
    %296 = vector.shape_cast %295 : vector<1x2x32xf32> to vector<2x32xf32>
    %297 = vector.shape_cast %294 : vector<2x32xf32> to vector<1x2x32xf32>
    tpu.vector_store %arg13[%c0_96, %c0_97, %c0_98], %297 {strides = array<i32>} : memref<2x2x32xf32, #tpu.memory_space<vmem>>, vector<1x2x32xf32>,
    %c0_99 = arith.constant 0 : index
    %c0_100 = arith.constant 0 : index
    %c0_101 = arith.constant 0 : index
    %298 = vector.load %arg14[%c0_99, %c0_100, %c0_101] : memref<2x2x32xf32, #tpu.memory_space<vmem>>, vector<1x2x32xf32>
    %299 = vector.shape_cast %298 : vector<1x2x32xf32> to vector<2x32xf32>
    %300 = vector.shape_cast %292 : vector<2x32xf32> to vector<1x2x32xf32>
    tpu.vector_store %arg14[%c0_99, %c0_100, %c0_101], %300 {strides = array<i32>} : memref<2x2x32xf32, #tpu.memory_space<vmem>>, vector<1x2x32xf32>,
    %301 = tpu.concatenate %56, %90, %124, %158, %192, %226, %260, %294 in 0 : vector<2x32xf32>, vector<2x32xf32>, vector<2x32xf32>, vector<2x32xf32>, vector<2x32xf32>, vector<2x32xf32>, vector<2x32xf32>, vector<2x32xf32> -> vector<16x32xf32>
    %c0_102 = arith.constant 0 : index
    %c0_103 = arith.constant 0 : index
    %302 = vector.load %arg7[%c0_102, %c0_103] : memref<32x128xf32, #tpu.memory_space<vmem>>, vector<32x128xf32>
    %c0_104 = arith.constant 0 : index
    %c0_105 = arith.constant 0 : index
    %303 = vector.load %arg8[%c0_104, %c0_105] : memref<32x128xf32, #tpu.memory_space<vmem>>, vector<32x128xf32>
    %c0_106 = arith.constant 0 : index
    %c0_107 = arith.constant 0 : index
    %304 = vector.load %arg9[%c0_106, %c0_107] : memref<1x128xf32, #tpu.memory_space<vmem>>, vector<1x128xf32>
    %cst_108 = arith.constant dense<0.000000e+00> : vector<16x128xf32>
    %305 = tpu.matmul %301, %302, %cst_108 {dimension_numbers = #tpu.dot_dimension_numbers<[1], [0], [0], [1], [0, 0, 1, 1], [], []>} : vector<16x32xf32>, vector<32x128xf32>, vector<16x128xf32> -> vector<16x128xf32>
    %306 = vector.broadcast %304 : vector<1x128xf32> to vector<16x128xf32>
    %307 = arith.addf %305, %306 : vector<16x128xf32>
    %c1 = arith.constant 1 : index
    %c0_109 = arith.constant 0 : index
    %c0_110 = arith.constant 0 : index
    %308 = vector.load %arg2[%c1, %c0_109, %c0_110] : memref<2x2x32xf32, #tpu.memory_space<vmem>>, vector<1x2x32xf32>
    %309 = vector.shape_cast %308 : vector<1x2x32xf32> to vector<2x32xf32>
    %c1_111 = arith.constant 1 : index
    %c0_112 = arith.constant 0 : index
    %c0_113 = arith.constant 0 : index
    %310 = vector.load %arg3[%c1_111, %c0_112, %c0_113] : memref<2x2x32xf32, #tpu.memory_space<vmem>>, vector<1x2x32xf32>
    %311 = vector.shape_cast %310 : vector<1x2x32xf32> to vector<2x32xf32>
    %312 = vector.extract_strided_slice %307 {offsets = [0, 0], sizes = [2, 128], strides = [1, 1]} : vector<16x128xf32> to vector<2x128xf32>
    %cst_114 = arith.constant dense<0.000000e+00> : vector<2x128xf32>
    %313 = tpu.matmul %309, %303, %cst_114 {dimension_numbers = #tpu.dot_dimension_numbers<[1], [0], [0], [1], [0, 0, 1, 1], [], []>} : vector<2x32xf32>, vector<32x128xf32>, vector<2x128xf32> -> vector<2x128xf32>
    %314 = arith.addf %312, %313 : vector<2x128xf32>
    %315 = vector.extract_strided_slice %314 {offsets = [0, 0], sizes = [2, 32], strides = [1, 1]} : vector<2x128xf32> to vector<2x32xf32>
    %cst_115 = arith.constant 0.000000e+00 : f32
    %316 = vector.broadcast %cst_115 : f32 to vector<2x32xf32>
    %317 = arith.subf %316, %315 : vector<2x32xf32>
    %318 = math.exp %317 : vector<2x32xf32>
    %cst_116 = arith.constant 1.000000e+00 : f32
    %319 = vector.broadcast %cst_116 : f32 to vector<2x32xf32>
    %320 = arith.addf %319, %318 : vector<2x32xf32>
    %cst_117 = arith.constant 1.000000e+00 : f32
    %321 = vector.broadcast %cst_117 : f32 to vector<2x32xf32>
    %322 = arith.divf %321, %320 : vector<2x32xf32>
    %323 = vector.extract_strided_slice %314 {offsets = [0, 32], sizes = [2, 32], strides = [1, 1]} : vector<2x128xf32> to vector<2x32xf32>
    %cst_118 = arith.constant 0.000000e+00 : f32
    %324 = vector.broadcast %cst_118 : f32 to vector<2x32xf32>
    %325 = arith.subf %324, %323 : vector<2x32xf32>
    %326 = math.exp %325 : vector<2x32xf32>
    %cst_119 = arith.constant 1.000000e+00 : f32
    %327 = vector.broadcast %cst_119 : f32 to vector<2x32xf32>
    %328 = arith.addf %327, %326 : vector<2x32xf32>
    %cst_120 = arith.constant 1.000000e+00 : f32
    %329 = vector.broadcast %cst_120 : f32 to vector<2x32xf32>
    %330 = arith.divf %329, %328 : vector<2x32xf32>
    %331 = vector.extract_strided_slice %314 {offsets = [0, 64], sizes = [2, 32], strides = [1, 1]} : vector<2x128xf32> to vector<2x32xf32>
    %332 = math.tanh %331 : vector<2x32xf32>
    %333 = vector.extract_strided_slice %314 {offsets = [0, 96], sizes = [2, 32], strides = [1, 1]} : vector<2x128xf32> to vector<2x32xf32>
    %cst_121 = arith.constant 0.000000e+00 : f32
    %334 = vector.broadcast %cst_121 : f32 to vector<2x32xf32>
    %335 = arith.subf %334, %333 : vector<2x32xf32>
    %336 = math.exp %335 : vector<2x32xf32>
    %cst_122 = arith.constant 1.000000e+00 : f32
    %337 = vector.broadcast %cst_122 : f32 to vector<2x32xf32>
    %338 = arith.addf %337, %336 : vector<2x32xf32>
    %cst_123 = arith.constant 1.000000e+00 : f32
    %339 = vector.broadcast %cst_123 : f32 to vector<2x32xf32>
    %340 = arith.divf %339, %338 : vector<2x32xf32>
    %341 = arith.mulf %330, %311 : vector<2x32xf32>
    %342 = arith.mulf %322, %332 : vector<2x32xf32>
    %343 = arith.addf %341, %342 : vector<2x32xf32>
    %344 = math.tanh %343 : vector<2x32xf32>
    %345 = arith.mulf %340, %344 : vector<2x32xf32>
    %346 = vector.extract_strided_slice %307 {offsets = [2, 0], sizes = [2, 128], strides = [1, 1]} : vector<16x128xf32> to vector<2x128xf32>
    %cst_124 = arith.constant dense<0.000000e+00> : vector<2x128xf32>
    %347 = tpu.matmul %345, %303, %cst_124 {dimension_numbers = #tpu.dot_dimension_numbers<[1], [0], [0], [1], [0, 0, 1, 1], [], []>} : vector<2x32xf32>, vector<32x128xf32>, vector<2x128xf32> -> vector<2x128xf32>
    %348 = arith.addf %346, %347 : vector<2x128xf32>
    %349 = vector.extract_strided_slice %348 {offsets = [0, 0], sizes = [2, 32], strides = [1, 1]} : vector<2x128xf32> to vector<2x32xf32>
    %cst_125 = arith.constant 0.000000e+00 : f32
    %350 = vector.broadcast %cst_125 : f32 to vector<2x32xf32>
    %351 = arith.subf %350, %349 : vector<2x32xf32>
    %352 = math.exp %351 : vector<2x32xf32>
    %cst_126 = arith.constant 1.000000e+00 : f32
    %353 = vector.broadcast %cst_126 : f32 to vector<2x32xf32>
    %354 = arith.addf %353, %352 : vector<2x32xf32>
    %cst_127 = arith.constant 1.000000e+00 : f32
    %355 = vector.broadcast %cst_127 : f32 to vector<2x32xf32>
    %356 = arith.divf %355, %354 : vector<2x32xf32>
    %357 = vector.extract_strided_slice %348 {offsets = [0, 32], sizes = [2, 32], strides = [1, 1]} : vector<2x128xf32> to vector<2x32xf32>
    %cst_128 = arith.constant 0.000000e+00 : f32
    %358 = vector.broadcast %cst_128 : f32 to vector<2x32xf32>
    %359 = arith.subf %358, %357 : vector<2x32xf32>
    %360 = math.exp %359 : vector<2x32xf32>
    %cst_129 = arith.constant 1.000000e+00 : f32
    %361 = vector.broadcast %cst_129 : f32 to vector<2x32xf32>
    %362 = arith.addf %361, %360 : vector<2x32xf32>
    %cst_130 = arith.constant 1.000000e+00 : f32
    %363 = vector.broadcast %cst_130 : f32 to vector<2x32xf32>
    %364 = arith.divf %363, %362 : vector<2x32xf32>
    %365 = vector.extract_strided_slice %348 {offsets = [0, 64], sizes = [2, 32], strides = [1, 1]} : vector<2x128xf32> to vector<2x32xf32>
    %366 = math.tanh %365 : vector<2x32xf32>
    %367 = vector.extract_strided_slice %348 {offsets = [0, 96], sizes = [2, 32], strides = [1, 1]} : vector<2x128xf32> to vector<2x32xf32>
    %cst_131 = arith.constant 0.000000e+00 : f32
    %368 = vector.broadcast %cst_131 : f32 to vector<2x32xf32>
    %369 = arith.subf %368, %367 : vector<2x32xf32>
    %370 = math.exp %369 : vector<2x32xf32>
    %cst_132 = arith.constant 1.000000e+00 : f32
    %371 = vector.broadcast %cst_132 : f32 to vector<2x32xf32>
    %372 = arith.addf %371, %370 : vector<2x32xf32>
    %cst_133 = arith.constant 1.000000e+00 : f32
    %373 = vector.broadcast %cst_133 : f32 to vector<2x32xf32>
    %374 = arith.divf %373, %372 : vector<2x32xf32>
    %375 = arith.mulf %364, %343 : vector<2x32xf32>
    %376 = arith.mulf %356, %366 : vector<2x32xf32>
    %377 = arith.addf %375, %376 : vector<2x32xf32>
    %378 = math.tanh %377 : vector<2x32xf32>
    %379 = arith.mulf %374, %378 : vector<2x32xf32>
    %380 = vector.extract_strided_slice %307 {offsets = [4, 0], sizes = [2, 128], strides = [1, 1]} : vector<16x128xf32> to vector<2x128xf32>
    %cst_134 = arith.constant dense<0.000000e+00> : vector<2x128xf32>
    %381 = tpu.matmul %379, %303, %cst_134 {dimension_numbers = #tpu.dot_dimension_numbers<[1], [0], [0], [1], [0, 0, 1, 1], [], []>} : vector<2x32xf32>, vector<32x128xf32>, vector<2x128xf32> -> vector<2x128xf32>
    %382 = arith.addf %380, %381 : vector<2x128xf32>
    %383 = vector.extract_strided_slice %382 {offsets = [0, 0], sizes = [2, 32], strides = [1, 1]} : vector<2x128xf32> to vector<2x32xf32>
    %cst_135 = arith.constant 0.000000e+00 : f32
    %384 = vector.broadcast %cst_135 : f32 to vector<2x32xf32>
    %385 = arith.subf %384, %383 : vector<2x32xf32>
    %386 = math.exp %385 : vector<2x32xf32>
    %cst_136 = arith.constant 1.000000e+00 : f32
    %387 = vector.broadcast %cst_136 : f32 to vector<2x32xf32>
    %388 = arith.addf %387, %386 : vector<2x32xf32>
    %cst_137 = arith.constant 1.000000e+00 : f32
    %389 = vector.broadcast %cst_137 : f32 to vector<2x32xf32>
    %390 = arith.divf %389, %388 : vector<2x32xf32>
    %391 = vector.extract_strided_slice %382 {offsets = [0, 32], sizes = [2, 32], strides = [1, 1]} : vector<2x128xf32> to vector<2x32xf32>
    %cst_138 = arith.constant 0.000000e+00 : f32
    %392 = vector.broadcast %cst_138 : f32 to vector<2x32xf32>
    %393 = arith.subf %392, %391 : vector<2x32xf32>
    %394 = math.exp %393 : vector<2x32xf32>
    %cst_139 = arith.constant 1.000000e+00 : f32
    %395 = vector.broadcast %cst_139 : f32 to vector<2x32xf32>
    %396 = arith.addf %395, %394 : vector<2x32xf32>
    %cst_140 = arith.constant 1.000000e+00 : f32
    %397 = vector.broadcast %cst_140 : f32 to vector<2x32xf32>
    %398 = arith.divf %397, %396 : vector<2x32xf32>
    %399 = vector.extract_strided_slice %382 {offsets = [0, 64], sizes = [2, 32], strides = [1, 1]} : vector<2x128xf32> to vector<2x32xf32>
    %400 = math.tanh %399 : vector<2x32xf32>
    %401 = vector.extract_strided_slice %382 {offsets = [0, 96], sizes = [2, 32], strides = [1, 1]} : vector<2x128xf32> to vector<2x32xf32>
    %cst_141 = arith.constant 0.000000e+00 : f32
    %402 = vector.broadcast %cst_141 : f32 to vector<2x32xf32>
    %403 = arith.subf %402, %401 : vector<2x32xf32>
    %404 = math.exp %403 : vector<2x32xf32>
    %cst_142 = arith.constant 1.000000e+00 : f32
    %405 = vector.broadcast %cst_142 : f32 to vector<2x32xf32>
    %406 = arith.addf %405, %404 : vector<2x32xf32>
    %cst_143 = arith.constant 1.000000e+00 : f32
    %407 = vector.broadcast %cst_143 : f32 to vector<2x32xf32>
    %408 = arith.divf %407, %406 : vector<2x32xf32>
    %409 = arith.mulf %398, %377 : vector<2x32xf32>
    %410 = arith.mulf %390, %400 : vector<2x32xf32>
    %411 = arith.addf %409, %410 : vector<2x32xf32>
    %412 = math.tanh %411 : vector<2x32xf32>
    %413 = arith.mulf %408, %412 : vector<2x32xf32>
    %414 = vector.extract_strided_slice %307 {offsets = [6, 0], sizes = [2, 128], strides = [1, 1]} : vector<16x128xf32> to vector<2x128xf32>
    %cst_144 = arith.constant dense<0.000000e+00> : vector<2x128xf32>
    %415 = tpu.matmul %413, %303, %cst_144 {dimension_numbers = #tpu.dot_dimension_numbers<[1], [0], [0], [1], [0, 0, 1, 1], [], []>} : vector<2x32xf32>, vector<32x128xf32>, vector<2x128xf32> -> vector<2x128xf32>
    %416 = arith.addf %414, %415 : vector<2x128xf32>
    %417 = vector.extract_strided_slice %416 {offsets = [0, 0], sizes = [2, 32], strides = [1, 1]} : vector<2x128xf32> to vector<2x32xf32>
    %cst_145 = arith.constant 0.000000e+00 : f32
    %418 = vector.broadcast %cst_145 : f32 to vector<2x32xf32>
    %419 = arith.subf %418, %417 : vector<2x32xf32>
    %420 = math.exp %419 : vector<2x32xf32>
    %cst_146 = arith.constant 1.000000e+00 : f32
    %421 = vector.broadcast %cst_146 : f32 to vector<2x32xf32>
    %422 = arith.addf %421, %420 : vector<2x32xf32>
    %cst_147 = arith.constant 1.000000e+00 : f32
    %423 = vector.broadcast %cst_147 : f32 to vector<2x32xf32>
    %424 = arith.divf %423, %422 : vector<2x32xf32>
    %425 = vector.extract_strided_slice %416 {offsets = [0, 32], sizes = [2, 32], strides = [1, 1]} : vector<2x128xf32> to vector<2x32xf32>
    %cst_148 = arith.constant 0.000000e+00 : f32
    %426 = vector.broadcast %cst_148 : f32 to vector<2x32xf32>
    %427 = arith.subf %426, %425 : vector<2x32xf32>
    %428 = math.exp %427 : vector<2x32xf32>
    %cst_149 = arith.constant 1.000000e+00 : f32
    %429 = vector.broadcast %cst_149 : f32 to vector<2x32xf32>
    %430 = arith.addf %429, %428 : vector<2x32xf32>
    %cst_150 = arith.constant 1.000000e+00 : f32
    %431 = vector.broadcast %cst_150 : f32 to vector<2x32xf32>
    %432 = arith.divf %431, %430 : vector<2x32xf32>
    %433 = vector.extract_strided_slice %416 {offsets = [0, 64], sizes = [2, 32], strides = [1, 1]} : vector<2x128xf32> to vector<2x32xf32>
    %434 = math.tanh %433 : vector<2x32xf32>
    %435 = vector.extract_strided_slice %416 {offsets = [0, 96], sizes = [2, 32], strides = [1, 1]} : vector<2x128xf32> to vector<2x32xf32>
    %cst_151 = arith.constant 0.000000e+00 : f32
    %436 = vector.broadcast %cst_151 : f32 to vector<2x32xf32>
    %437 = arith.subf %436, %435 : vector<2x32xf32>
    %438 = math.exp %437 : vector<2x32xf32>
    %cst_152 = arith.constant 1.000000e+00 : f32
    %439 = vector.broadcast %cst_152 : f32 to vector<2x32xf32>
    %440 = arith.addf %439, %438 : vector<2x32xf32>
    %cst_153 = arith.constant 1.000000e+00 : f32
    %441 = vector.broadcast %cst_153 : f32 to vector<2x32xf32>
    %442 = arith.divf %441, %440 : vector<2x32xf32>
    %443 = arith.mulf %432, %411 : vector<2x32xf32>
    %444 = arith.mulf %424, %434 : vector<2x32xf32>
    %445 = arith.addf %443, %444 : vector<2x32xf32>
    %446 = math.tanh %445 : vector<2x32xf32>
    %447 = arith.mulf %442, %446 : vector<2x32xf32>
    %448 = vector.extract_strided_slice %307 {offsets = [8, 0], sizes = [2, 128], strides = [1, 1]} : vector<16x128xf32> to vector<2x128xf32>
    %cst_154 = arith.constant dense<0.000000e+00> : vector<2x128xf32>
    %449 = tpu.matmul %447, %303, %cst_154 {dimension_numbers = #tpu.dot_dimension_numbers<[1], [0], [0], [1], [0, 0, 1, 1], [], []>} : vector<2x32xf32>, vector<32x128xf32>, vector<2x128xf32> -> vector<2x128xf32>
    %450 = arith.addf %448, %449 : vector<2x128xf32>
    %451 = vector.extract_strided_slice %450 {offsets = [0, 0], sizes = [2, 32], strides = [1, 1]} : vector<2x128xf32> to vector<2x32xf32>
    %cst_155 = arith.constant 0.000000e+00 : f32
    %452 = vector.broadcast %cst_155 : f32 to vector<2x32xf32>
    %453 = arith.subf %452, %451 : vector<2x32xf32>
    %454 = math.exp %453 : vector<2x32xf32>
    %cst_156 = arith.constant 1.000000e+00 : f32
    %455 = vector.broadcast %cst_156 : f32 to vector<2x32xf32>
    %456 = arith.addf %455, %454 : vector<2x32xf32>
    %cst_157 = arith.constant 1.000000e+00 : f32
    %457 = vector.broadcast %cst_157 : f32 to vector<2x32xf32>
    %458 = arith.divf %457, %456 : vector<2x32xf32>
    %459 = vector.extract_strided_slice %450 {offsets = [0, 32], sizes = [2, 32], strides = [1, 1]} : vector<2x128xf32> to vector<2x32xf32>
    %cst_158 = arith.constant 0.000000e+00 : f32
    %460 = vector.broadcast %cst_158 : f32 to vector<2x32xf32>
    %461 = arith.subf %460, %459 : vector<2x32xf32>
    %462 = math.exp %461 : vector<2x32xf32>
    %cst_159 = arith.constant 1.000000e+00 : f32
    %463 = vector.broadcast %cst_159 : f32 to vector<2x32xf32>
    %464 = arith.addf %463, %462 : vector<2x32xf32>
    %cst_160 = arith.constant 1.000000e+00 : f32
    %465 = vector.broadcast %cst_160 : f32 to vector<2x32xf32>
    %466 = arith.divf %465, %464 : vector<2x32xf32>
    %467 = vector.extract_strided_slice %450 {offsets = [0, 64], sizes = [2, 32], strides = [1, 1]} : vector<2x128xf32> to vector<2x32xf32>
    %468 = math.tanh %467 : vector<2x32xf32>
    %469 = vector.extract_strided_slice %450 {offsets = [0, 96], sizes = [2, 32], strides = [1, 1]} : vector<2x128xf32> to vector<2x32xf32>
    %cst_161 = arith.constant 0.000000e+00 : f32
    %470 = vector.broadcast %cst_161 : f32 to vector<2x32xf32>
    %471 = arith.subf %470, %469 : vector<2x32xf32>
    %472 = math.exp %471 : vector<2x32xf32>
    %cst_162 = arith.constant 1.000000e+00 : f32
    %473 = vector.broadcast %cst_162 : f32 to vector<2x32xf32>
    %474 = arith.addf %473, %472 : vector<2x32xf32>
    %cst_163 = arith.constant 1.000000e+00 : f32
    %475 = vector.broadcast %cst_163 : f32 to vector<2x32xf32>
    %476 = arith.divf %475, %474 : vector<2x32xf32>
    %477 = arith.mulf %466, %445 : vector<2x32xf32>
    %478 = arith.mulf %458, %468 : vector<2x32xf32>
    %479 = arith.addf %477, %478 : vector<2x32xf32>
    %480 = math.tanh %479 : vector<2x32xf32>
    %481 = arith.mulf %476, %480 : vector<2x32xf32>
    %482 = vector.extract_strided_slice %307 {offsets = [10, 0], sizes = [2, 128], strides = [1, 1]} : vector<16x128xf32> to vector<2x128xf32>
    %cst_164 = arith.constant dense<0.000000e+00> : vector<2x128xf32>
    %483 = tpu.matmul %481, %303, %cst_164 {dimension_numbers = #tpu.dot_dimension_numbers<[1], [0], [0], [1], [0, 0, 1, 1], [], []>} : vector<2x32xf32>, vector<32x128xf32>, vector<2x128xf32> -> vector<2x128xf32>
    %484 = arith.addf %482, %483 : vector<2x128xf32>
    %485 = vector.extract_strided_slice %484 {offsets = [0, 0], sizes = [2, 32], strides = [1, 1]} : vector<2x128xf32> to vector<2x32xf32>
    %cst_165 = arith.constant 0.000000e+00 : f32
    %486 = vector.broadcast %cst_165 : f32 to vector<2x32xf32>
    %487 = arith.subf %486, %485 : vector<2x32xf32>
    %488 = math.exp %487 : vector<2x32xf32>
    %cst_166 = arith.constant 1.000000e+00 : f32
    %489 = vector.broadcast %cst_166 : f32 to vector<2x32xf32>
    %490 = arith.addf %489, %488 : vector<2x32xf32>
    %cst_167 = arith.constant 1.000000e+00 : f32
    %491 = vector.broadcast %cst_167 : f32 to vector<2x32xf32>
    %492 = arith.divf %491, %490 : vector<2x32xf32>
    %493 = vector.extract_strided_slice %484 {offsets = [0, 32], sizes = [2, 32], strides = [1, 1]} : vector<2x128xf32> to vector<2x32xf32>
    %cst_168 = arith.constant 0.000000e+00 : f32
    %494 = vector.broadcast %cst_168 : f32 to vector<2x32xf32>
    %495 = arith.subf %494, %493 : vector<2x32xf32>
    %496 = math.exp %495 : vector<2x32xf32>
    %cst_169 = arith.constant 1.000000e+00 : f32
    %497 = vector.broadcast %cst_169 : f32 to vector<2x32xf32>
    %498 = arith.addf %497, %496 : vector<2x32xf32>
    %cst_170 = arith.constant 1.000000e+00 : f32
    %499 = vector.broadcast %cst_170 : f32 to vector<2x32xf32>
    %500 = arith.divf %499, %498 : vector<2x32xf32>
    %501 = vector.extract_strided_slice %484 {offsets = [0, 64], sizes = [2, 32], strides = [1, 1]} : vector<2x128xf32> to vector<2x32xf32>
    %502 = math.tanh %501 : vector<2x32xf32>
    %503 = vector.extract_strided_slice %484 {offsets = [0, 96], sizes = [2, 32], strides = [1, 1]} : vector<2x128xf32> to vector<2x32xf32>
    %cst_171 = arith.constant 0.000000e+00 : f32
    %504 = vector.broadcast %cst_171 : f32 to vector<2x32xf32>
    %505 = arith.subf %504, %503 : vector<2x32xf32>
    %506 = math.exp %505 : vector<2x32xf32>
    %cst_172 = arith.constant 1.000000e+00 : f32
    %507 = vector.broadcast %cst_172 : f32 to vector<2x32xf32>
    %508 = arith.addf %507, %506 : vector<2x32xf32>
    %cst_173 = arith.constant 1.000000e+00 : f32
    %509 = vector.broadcast %cst_173 : f32 to vector<2x32xf32>
    %510 = arith.divf %509, %508 : vector<2x32xf32>
    %511 = arith.mulf %500, %479 : vector<2x32xf32>
    %512 = arith.mulf %492, %502 : vector<2x32xf32>
    %513 = arith.addf %511, %512 : vector<2x32xf32>
    %514 = math.tanh %513 : vector<2x32xf32>
    %515 = arith.mulf %510, %514 : vector<2x32xf32>
    %516 = vector.extract_strided_slice %307 {offsets = [12, 0], sizes = [2, 128], strides = [1, 1]} : vector<16x128xf32> to vector<2x128xf32>
    %cst_174 = arith.constant dense<0.000000e+00> : vector<2x128xf32>
    %517 = tpu.matmul %515, %303, %cst_174 {dimension_numbers = #tpu.dot_dimension_numbers<[1], [0], [0], [1], [0, 0, 1, 1], [], []>} : vector<2x32xf32>, vector<32x128xf32>, vector<2x128xf32> -> vector<2x128xf32>
    %518 = arith.addf %516, %517 : vector<2x128xf32>
    %519 = vector.extract_strided_slice %518 {offsets = [0, 0], sizes = [2, 32], strides = [1, 1]} : vector<2x128xf32> to vector<2x32xf32>
    %cst_175 = arith.constant 0.000000e+00 : f32
    %520 = vector.broadcast %cst_175 : f32 to vector<2x32xf32>
    %521 = arith.subf %520, %519 : vector<2x32xf32>
    %522 = math.exp %521 : vector<2x32xf32>
    %cst_176 = arith.constant 1.000000e+00 : f32
    %523 = vector.broadcast %cst_176 : f32 to vector<2x32xf32>
    %524 = arith.addf %523, %522 : vector<2x32xf32>
    %cst_177 = arith.constant 1.000000e+00 : f32
    %525 = vector.broadcast %cst_177 : f32 to vector<2x32xf32>
    %526 = arith.divf %525, %524 : vector<2x32xf32>
    %527 = vector.extract_strided_slice %518 {offsets = [0, 32], sizes = [2, 32], strides = [1, 1]} : vector<2x128xf32> to vector<2x32xf32>
    %cst_178 = arith.constant 0.000000e+00 : f32
    %528 = vector.broadcast %cst_178 : f32 to vector<2x32xf32>
    %529 = arith.subf %528, %527 : vector<2x32xf32>
    %530 = math.exp %529 : vector<2x32xf32>
    %cst_179 = arith.constant 1.000000e+00 : f32
    %531 = vector.broadcast %cst_179 : f32 to vector<2x32xf32>
    %532 = arith.addf %531, %530 : vector<2x32xf32>
    %cst_180 = arith.constant 1.000000e+00 : f32
    %533 = vector.broadcast %cst_180 : f32 to vector<2x32xf32>
    %534 = arith.divf %533, %532 : vector<2x32xf32>
    %535 = vector.extract_strided_slice %518 {offsets = [0, 64], sizes = [2, 32], strides = [1, 1]} : vector<2x128xf32> to vector<2x32xf32>
    %536 = math.tanh %535 : vector<2x32xf32>
    %537 = vector.extract_strided_slice %518 {offsets = [0, 96], sizes = [2, 32], strides = [1, 1]} : vector<2x128xf32> to vector<2x32xf32>
    %cst_181 = arith.constant 0.000000e+00 : f32
    %538 = vector.broadcast %cst_181 : f32 to vector<2x32xf32>
    %539 = arith.subf %538, %537 : vector<2x32xf32>
    %540 = math.exp %539 : vector<2x32xf32>
    %cst_182 = arith.constant 1.000000e+00 : f32
    %541 = vector.broadcast %cst_182 : f32 to vector<2x32xf32>
    %542 = arith.addf %541, %540 : vector<2x32xf32>
    %cst_183 = arith.constant 1.000000e+00 : f32
    %543 = vector.broadcast %cst_183 : f32 to vector<2x32xf32>
    %544 = arith.divf %543, %542 : vector<2x32xf32>
    %545 = arith.mulf %534, %513 : vector<2x32xf32>
    %546 = arith.mulf %526, %536 : vector<2x32xf32>
    %547 = arith.addf %545, %546 : vector<2x32xf32>
    %548 = math.tanh %547 : vector<2x32xf32>
    %549 = arith.mulf %544, %548 : vector<2x32xf32>
    %550 = vector.extract_strided_slice %307 {offsets = [14, 0], sizes = [2, 128], strides = [1, 1]} : vector<16x128xf32> to vector<2x128xf32>
    %cst_184 = arith.constant dense<0.000000e+00> : vector<2x128xf32>
    %551 = tpu.matmul %549, %303, %cst_184 {dimension_numbers = #tpu.dot_dimension_numbers<[1], [0], [0], [1], [0, 0, 1, 1], [], []>} : vector<2x32xf32>, vector<32x128xf32>, vector<2x128xf32> -> vector<2x128xf32>
    %552 = arith.addf %550, %551 : vector<2x128xf32>
    %553 = vector.extract_strided_slice %552 {offsets = [0, 0], sizes = [2, 32], strides = [1, 1]} : vector<2x128xf32> to vector<2x32xf32>
    %cst_185 = arith.constant 0.000000e+00 : f32
    %554 = vector.broadcast %cst_185 : f32 to vector<2x32xf32>
    %555 = arith.subf %554, %553 : vector<2x32xf32>
    %556 = math.exp %555 : vector<2x32xf32>
    %cst_186 = arith.constant 1.000000e+00 : f32
    %557 = vector.broadcast %cst_186 : f32 to vector<2x32xf32>
    %558 = arith.addf %557, %556 : vector<2x32xf32>
    %cst_187 = arith.constant 1.000000e+00 : f32
    %559 = vector.broadcast %cst_187 : f32 to vector<2x32xf32>
    %560 = arith.divf %559, %558 : vector<2x32xf32>
    %561 = vector.extract_strided_slice %552 {offsets = [0, 32], sizes = [2, 32], strides = [1, 1]} : vector<2x128xf32> to vector<2x32xf32>
    %cst_188 = arith.constant 0.000000e+00 : f32
    %562 = vector.broadcast %cst_188 : f32 to vector<2x32xf32>
    %563 = arith.subf %562, %561 : vector<2x32xf32>
    %564 = math.exp %563 : vector<2x32xf32>
    %cst_189 = arith.constant 1.000000e+00 : f32
    %565 = vector.broadcast %cst_189 : f32 to vector<2x32xf32>
    %566 = arith.addf %565, %564 : vector<2x32xf32>
    %cst_190 = arith.constant 1.000000e+00 : f32
    %567 = vector.broadcast %cst_190 : f32 to vector<2x32xf32>
    %568 = arith.divf %567, %566 : vector<2x32xf32>
    %569 = vector.extract_strided_slice %552 {offsets = [0, 64], sizes = [2, 32], strides = [1, 1]} : vector<2x128xf32> to vector<2x32xf32>
    %570 = math.tanh %569 : vector<2x32xf32>
    %571 = vector.extract_strided_slice %552 {offsets = [0, 96], sizes = [2, 32], strides = [1, 1]} : vector<2x128xf32> to vector<2x32xf32>
    %cst_191 = arith.constant 0.000000e+00 : f32
    %572 = vector.broadcast %cst_191 : f32 to vector<2x32xf32>
    %573 = arith.subf %572, %571 : vector<2x32xf32>
    %574 = math.exp %573 : vector<2x32xf32>
    %cst_192 = arith.constant 1.000000e+00 : f32
    %575 = vector.broadcast %cst_192 : f32 to vector<2x32xf32>
    %576 = arith.addf %575, %574 : vector<2x32xf32>
    %cst_193 = arith.constant 1.000000e+00 : f32
    %577 = vector.broadcast %cst_193 : f32 to vector<2x32xf32>
    %578 = arith.divf %577, %576 : vector<2x32xf32>
    %579 = arith.mulf %568, %547 : vector<2x32xf32>
    %580 = arith.mulf %560, %570 : vector<2x32xf32>
    %581 = arith.addf %579, %580 : vector<2x32xf32>
    %582 = math.tanh %581 : vector<2x32xf32>
    %583 = arith.mulf %578, %582 : vector<2x32xf32>
    %c1_194 = arith.constant 1 : index
    %c0_195 = arith.constant 0 : index
    %c0_196 = arith.constant 0 : index
    %584 = vector.load %arg13[%c1_194, %c0_195, %c0_196] : memref<2x2x32xf32, #tpu.memory_space<vmem>>, vector<1x2x32xf32>
    %585 = vector.shape_cast %584 : vector<1x2x32xf32> to vector<2x32xf32>
    %586 = vector.shape_cast %583 : vector<2x32xf32> to vector<1x2x32xf32>
    tpu.vector_store %arg13[%c1_194, %c0_195, %c0_196], %586 {strides = array<i32>} : memref<2x2x32xf32, #tpu.memory_space<vmem>>, vector<1x2x32xf32>,
    %c1_197 = arith.constant 1 : index
    %c0_198 = arith.constant 0 : index
    %c0_199 = arith.constant 0 : index
    %587 = vector.load %arg14[%c1_197, %c0_198, %c0_199] : memref<2x2x32xf32, #tpu.memory_space<vmem>>, vector<1x2x32xf32>
    %588 = vector.shape_cast %587 : vector<1x2x32xf32> to vector<2x32xf32>
    %589 = vector.shape_cast %581 : vector<2x32xf32> to vector<1x2x32xf32>
    tpu.vector_store %arg14[%c1_197, %c0_198, %c0_199], %589 {strides = array<i32>} : memref<2x2x32xf32, #tpu.memory_space<vmem>>, vector<1x2x32xf32>,
    %590 = tpu.concatenate %345, %379, %413, %447, %481, %515, %549, %583 in 0 : vector<2x32xf32>, vector<2x32xf32>, vector<2x32xf32>, vector<2x32xf32>, vector<2x32xf32>, vector<2x32xf32>, vector<2x32xf32>, vector<2x32xf32> -> vector<16x32xf32>
    %c0_200 = arith.constant 0 : index
    %c0_201 = arith.constant 0 : index
    %591 = vector.load %arg10[%c0_200, %c0_201] : memref<32x128xf32, #tpu.memory_space<vmem>>, vector<32x128xf32>
    %cst_202 = arith.constant dense<0.000000e+00> : vector<16x128xf32>
    %592 = tpu.matmul %590, %591, %cst_202 {dimension_numbers = #tpu.dot_dimension_numbers<[1], [0], [0], [1], [0, 0, 1, 1], [], []>} : vector<16x32xf32>, vector<32x128xf32>, vector<16x128xf32> -> vector<16x128xf32>
    %c0_203 = arith.constant 0 : index
    %c0_204 = arith.constant 0 : index
    %593 = vector.load %arg11[%c0_203, %c0_204] : memref<1x128xf32, #tpu.memory_space<vmem>>, vector<1x128xf32>
    %594 = vector.broadcast %593 : vector<1x128xf32> to vector<16x128xf32>
    %595 = arith.addf %592, %594 : vector<16x128xf32>
    %c0_205 = arith.constant 0 : index
    %c0_206 = arith.constant 0 : index
    %596 = vector.load %arg12[%c0_205, %c0_206] : memref<16x128xf32, #tpu.memory_space<vmem>>, vector<16x128xf32>
    tpu.vector_store %arg12[%c0_205, %c0_206], %595 {strides = array<i32>} : memref<16x128xf32, #tpu.memory_space<vmem>>, vector<16x128xf32>,
    return
  }
}

</mosaic_0001>

<bundles_post_ra>
// kernel: tpu_custom_call.1
= control target key start
LH: loop header
LB: loop body
LE: loop exit
PB: predicated region body
PF: predicated region fallthrough
CT: control target
= control target key end

     0   :  { %20 = vsyncpa [#allocation3], 0  ;;  %s4397_s0 = inlined_call_operand.vmem [shape: s32[16,1], index: 0, kind: input, shape index: {}]   ;;  %s4398_s1 = inlined_call_operand.vmem [shape: f32[16,50], index: 1, kind: input, shape index: {}]   ;;  %s4399_s2 = inlined_call_operand.hbm [shape: f32[2,2,32], index: 2, kind: input, shape index: {}, may-alias: {2,13}]   ;;  %s4400_s3 = inlined_call_operand.hbm [shape: f32[2,2,32], index: 3, kind: input, shape index: {}, may-alias: {3,14}]   ;;  %s4401_s4 = inlined_call_operand.hbm [shape: f32[16,128], index: 4, kind: input, shape index: {}]   ;;  %s4402_s5 = inlined_call_operand.vmem [shape: f32[32,128], index: 5, kind: input, shape index: {}]   ;;  %s4403_s6 = inlined_call_operand.vmem [shape: f32[1,128], index: 6, kind: input, shape index: {}]   ;;  %s4404_s7 = inlined_call_operand.hbm [shape: f32[32,128], index: 7, kind: input, shape index: {}]   ;;  %s4405_s8 = inlined_call_operand.hbm [shape: f32[32,128], index: 8, kind: input, shape index: {}]   ;;  %s4406_s9 = inlined_call_operand.vmem [shape: f32[1,128], index: 9, kind: input, shape index: {}]   ;;  %s4407_s10 = inlined_call_operand.hbm [shape: f32[32,128], index: 10, kind: input, shape index: {}]   ;;  %s4408_s11 = inlined_call_operand.vmem [shape: f32[1,128], index: 11, kind: input, shape index: {}]   ;;  %s4409_s12 = inlined_call_operand.hbm [shape: f32[16,128], index: 12, kind: output, shape index: {0}]   ;;  %s4410_s13 = inlined_call_operand.hbm [shape: f32[2,2,32], index: 13, kind: output, shape index: {1}, may-alias: {2,13}]   ;;  %s4411_s14 = inlined_call_operand.hbm [shape: f32[2,2,32], index: 14, kind: output, shape index: {2}, may-alias: {3,14}]  }
   0x1   :  { %21 = vsyncpa [#allocation6], 0 }
   0x2   :  { %22 = vsyncpa [#allocation9], 0 }
   0x3   :  { %23 = vsyncpa [#allocation12], 0 }
   0x4   :  { %24 = vsyncpa [#allocation4], 0 }
   0x5   :  { %25 = vsyncpa [#allocation15], 0  ;;  %s3610_s29 = smov [#allocation5]   ;;  %s3400_s17 = scalar_lea.hbm %s4400_s3, 64 }
   0x6   :  { %s47_s30 = sshll.u32 %s3610_s29, 4  ;;  %p3401_p0 = scmp.ne.s32.totalorder %s4400_s3, %s3400_s17  ;;  %s48_s30 = int_to_ptr.vmem [resolvable:$true] %s47_s30 }
   0x7   :  { %p3404_p1 = scmp.lt.u32.totalorder %s3400_s17, %s4400_s3 }
   0x9   :  { %p3406_p2 = pnand %p3404_p1, %p3401_p0 }
   0xb   :  { %3409 = shalt.err (!%p3406_p2)
}
   0xc   :  { %s3410_s22 = scalar_lea.vmem %s48_s30, 64  ;;  %p3415_p4 = scmp.lt.s32.totalorder %s48_s30, %s48_s30 }
   0xd   :  { %p3411_p3 = scmp.ne.s32.totalorder %s48_s30, %s3410_s22  ;;  %p3416_p5 = scmp.lt.s32.totalorder %s3410_s22, %s3410_s22 }
   0xf   :  { %p3417_p6 = por %p3416_p5, %p3415_p4 }
  0x11   :  { %p3418_p7 = pnand %p3417_p6, %p3411_p3 }
  0x13   :  { %3421 = shalt.err (!%p3418_p7)
}
  0x14   :  { %s3611_s23 = smov 32   ;;  %s3612_s24 = smov 2  }
  0x15   :  { %53 = dma.hbm_to_vmem [thread:$0]  %s4400_s3, 64, %s48_s30, [#allocation6], %s3611_s23, %s3611_s23, %s3612_s24  }
  0x16   :  { %s3613_s27 = smov [#allocation8]   ;;  %s3614_s29 = smov [#allocation2]  }
  0x17   :  { %s75_s28 = sshll.u32 %s3613_s27, 4  ;;  %s35_s15 = sshll.u32 %s3614_s29, 4  ;;  %s76_s28 = int_to_ptr.vmem [resolvable:$true] %s75_s28  ;;  %s36_s15 = int_to_ptr.vmem [resolvable:$true] %s35_s15 }
  0x18   :  { %s3422_s18 = scalar_lea.hbm %s4404_s7, 512 }
  0x19   :  { %p3423_p8 = scmp.ne.s32.totalorder %s4404_s7, %s3422_s18  ;;  %p3426_p9 = scmp.lt.u32.totalorder %s3422_s18, %s4404_s7 }
  0x1b   :  { %p3428_p10 = pnand %p3426_p9, %p3423_p8 }
  0x1d   :  { %3431 = shalt.err (!%p3428_p10)
}
  0x1e   :  { %s3432_s3 = scalar_lea.vmem %s76_s28, 512  ;;  %p3437_p12 = scmp.lt.s32.totalorder %s76_s28, %s76_s28 }
  0x1f   :  { %p3433_p11 = scmp.ne.s32.totalorder %s76_s28, %s3432_s3  ;;  %p3438_p13 = scmp.lt.s32.totalorder %s3432_s3, %s3432_s3 }
  0x21   :  { %p3439_p0 = por %p3438_p13, %p3437_p12 }
  0x23   :  { %p3440_p1 = pnand %p3439_p0, %p3433_p11 }
  0x25   :  { %3443 = shalt.err (!%p3440_p1)
}
  0x26   :  { %s3615_s30 = smov 128   ;;  %s3616_s25 = smov 8  }
  0x27   :  { %81 = dma.hbm_to_vmem [thread:$0]  %s4404_s7, 512, %s76_s28, [#allocation9], %s3615_s30, %s3615_s30, %s3616_s25  }
  0x28   :  { %s3444_s17 = scalar_lea.hbm %s4399_s2, 64 }
  0x29   :  { %p3445_p2 = scmp.ne.s32.totalorder %s4399_s2, %s3444_s17  ;;  %p3448_p3 = scmp.lt.u32.totalorder %s3444_s17, %s4399_s2 }
  0x2b   :  { %p3450_p4 = pnand %p3448_p3, %p3445_p2 }
  0x2d   :  { %3453 = shalt.err (!%p3450_p4)
}
  0x2e   :  { %s3454_s22 = scalar_lea.vmem %s36_s15, 64  ;;  %p3459_p6 = scmp.lt.s32.totalorder %s36_s15, %s36_s15 }
  0x2f   :  { %p3455_p5 = scmp.ne.s32.totalorder %s36_s15, %s3454_s22  ;;  %p3460_p7 = scmp.lt.s32.totalorder %s3454_s22, %s3454_s22 }
  0x31   :  { %p3461_p8 = por %p3460_p7, %p3459_p6 }
  0x33   :  { %p3462_p9 = pnand %p3461_p8, %p3455_p5 }
  0x35   :  { %3465 = shalt.err (!%p3462_p9)
}
  0x36   :  { %41 = dma.hbm_to_vmem [thread:$0]  %s4399_s2, 64, %s36_s15, [#allocation3], %s3611_s23, %s3611_s23, %s3612_s24  }
  0x37   :  { %s3617_s3 = smov [#allocation7]   ;;  %s3618_s27 = smov [#allocation10]  }
  0x38   :  { %s59_s26 = sshll.u32 %s3617_s3, 4  ;;  %s87_s29 = sshll.u32 %s3618_s27, 4  ;;  %s60_s26 = int_to_ptr.vmem [resolvable:$true] %s59_s26  ;;  %s88_s29 = int_to_ptr.vmem [resolvable:$true] %s87_s29 }
  0x39   :  { %s3466_s18 = scalar_lea.hbm %s4401_s4, 256 }
  0x3a   :  { %p3467_p10 = scmp.ne.s32.totalorder %s4401_s4, %s3466_s18  ;;  %p3470_p11 = scmp.lt.u32.totalorder %s3466_s18, %s4401_s4 }
  0x3c   :  { %p3472_p12 = pnand %p3470_p11, %p3467_p10 }
  0x3e   :  { %3475 = shalt.err (!%p3472_p12)
}
  0x3f   :  { %s3476_s2 = scalar_lea.vmem %s60_s26, 256  ;;  %p3481_p0 = scmp.lt.s32.totalorder %s60_s26, %s60_s26 }
  0x40   :  { %p3477_p13 = scmp.ne.s32.totalorder %s60_s26, %s3476_s2  ;;  %p3482_p1 = scmp.lt.s32.totalorder %s3476_s2, %s3476_s2 }
  0x42   :  { %p3483_p2 = por %p3482_p1, %p3481_p0 }
  0x44   :  { %p3484_p3 = pnand %p3483_p2, %p3477_p13 }
  0x46   :  { %3487 = shalt.err (!%p3484_p3)
}
  0x47   :  { %65 = dma.hbm_to_vmem [thread:$0]  %s4401_s4, 256, %s60_s26, [#allocation6], %s3615_s30, %s3615_s30, %s3616_s25  }
  0x48   :  { %s3488_s27 = scalar_lea.hbm %s4405_s8, 512 }
  0x49   :  { %p3489_p4 = scmp.ne.s32.totalorder %s4405_s8, %s3488_s27  ;;  %p3492_p5 = scmp.lt.u32.totalorder %s3488_s27, %s4405_s8 }
  0x4b   :  { %p3494_p6 = pnand %p3492_p5, %p3489_p4 }
  0x4d   :  { %3497 = shalt.err (!%p3494_p6)
}
  0x4e   :  { %s3498_s20 = scalar_lea.vmem %s88_s29, 512  ;;  %p3503_p8 = scmp.lt.s32.totalorder %s88_s29, %s88_s29 }
  0x4f   :  { %p3499_p7 = scmp.ne.s32.totalorder %s88_s29, %s3498_s20  ;;  %p3504_p9 = scmp.lt.s32.totalorder %s3498_s20, %s3498_s20 }
  0x51   :  { %p3505_p10 = por %p3504_p9, %p3503_p8 }
  0x53   :  { %p3506_p11 = pnand %p3505_p10, %p3499_p7 }
  0x55   :  { %3509 = shalt.err (!%p3506_p11)
}
  0x56   :  { %93 = dma.hbm_to_vmem [thread:$0]  %s4405_s8, 512, %s88_s29, [#allocation9], %s3615_s30, %s3615_s30, %s3616_s25  }
  0x57   :  { %s3619_s21 = smov [#allocation11]   ;;  %s3510_s7 = scalar_lea.hbm %s4407_s10, 512 }
  0x58   :  { %s101_s22 = sshll.u32 %s3619_s21, 4  ;;  %p3511_p12 = scmp.ne.s32.totalorder %s4407_s10, %s3510_s7  ;;  %s102_s22 = int_to_ptr.vmem [resolvable:$true] %s101_s22 }
  0x59   :  { %p3514_p13 = scmp.lt.u32.totalorder %s3510_s7, %s4407_s10 }
  0x5b   :  { %p3516_p0 = pnand %p3514_p13, %p3511_p12 }
  0x5d   :  { %3519 = shalt.err (!%p3516_p0)
}
  0x5e   :  { %s3520_s17 = scalar_lea.vmem %s102_s22, 512  ;;  %p3525_p2 = scmp.lt.s32.totalorder %s102_s22, %s102_s22 }
  0x5f   :  { %p3521_p1 = scmp.ne.s32.totalorder %s102_s22, %s3520_s17  ;;  %p3526_p3 = scmp.lt.s32.totalorder %s3520_s17, %s3520_s17 }
  0x61   :  { %p3527_p4 = por %p3526_p3, %p3525_p2 }
  0x63   :  { %p3528_p5 = pnand %p3527_p4, %p3521_p1 }
  0x65   :  { %3531 = shalt.err (!%p3528_p5)
}
  0x66   :  { %107 = dma.hbm_to_vmem [thread:$0]  %s4407_s10, 512, %s102_s22, [#allocation12], %s3615_s30, %s3615_s30, %s3616_s25  }
  0x67   :  { %3598 = dma.done.wait [#allocation3], 64  }
  0x68   :  { %3599 = vsyncadd [#allocation3], 4294967232 }
  0x69   :  { %3600 = dma.done.wait [#allocation6], 320  }
  0x6a   :  { %3601 = vsyncadd [#allocation6], 4294966976 }
  0x6b   :  { %3602 = dma.done.wait [#allocation9], 1024  }
  0x6c   :  { %3603 = vsyncadd [#allocation9], 4294966272 }
  0x6d   :  { %3604 = dma.done.wait [#allocation12], 512  }
  0x6e   :  { %3605 = vsyncadd [#allocation12], 4294966784  ;;  %v3620_v0 = vmov 0   ;;  %v128_v1 = vld [vmem:[%s4397_s0] sm:$0xff]  ;;  %v129_v2 = vld [vmem:[%s4397_s0 + $0x8] sm:$0xff]  ;;  %v130_v3 = vlaneseq  ;;  %v3622_v24 = vmov 0.0  }
  0x6f   :  { %3271 = vset.pattern.permute.xlu0 %v3620_v0  ;;  %v3621_v4 = vmov 1966171168   ;;  %v3827_v28 = vld [vmem:[%s4398_s1] sm:$0xff]  ;;  %vm418_vm5 = vcmask 408576   ;;  %v3836_v33 = vld [vmem:[%s4398_s1 + $0x8] sm:$0xff]  ;;  %s3625_s17 = smov 64  }
  0x70   :  { %133 = vperm.xlu0 %3271, %v128_v1   ;;  %v146_v5 = vunpack.c.l.s4 %v3621_v4  ;;  %v3801_v7 = vshrl.u32 %v130_v3, 7  ;;  %v3803_v8 = vand.u32 127, %v130_v3  ;;  %s3627_s29 = smov [#allocation14]  }
  0x71   :  { %s2759_s18 = sshll.u32 %s3627_s29, 4  ;;  %s2760_s18 = int_to_ptr.vmem [resolvable:$true] %s2759_s18 }
  0x72   :  { %v147_v6 = vunpack.c.0.s8 %v146_v5  ;;  %v3814_v18 = vsub.s32 0, %v3801_v7  ;;  %s3532_s19 = scalar_lea.vmem %s2760_s18, 64  ;;  %p3537_p7 = scmp.lt.s32.totalorder %s2760_s18, %s2760_s18 }
  0x73   :  { %p3533_p6 = scmp.ne.s32.totalorder %s2760_s18, %s3532_s19  ;;  %p3538_p8 = scmp.lt.s32.totalorder %s3532_s19, %s3532_s19 }
  0x74   :  { %136 = vperm.xlu0 %3271, %v129_v2   ;;  %v3806_v9 = vsub.s32 %v147_v6, %v3801_v7 }
  0x75   :  { %p3539_p9 = por %p3538_p8, %p3537_p7 }
  0x77   :  { %p3540_p10 = pnand %p3539_p9, %p3533_p6 }
  0xef   :  { %v134_v10 = vpop.permute.xlu0 %133 }
  0xf0   :  { %vm138_vm0 = vcmp.eq.s32.totalorder %v3803_v8, %v134_v10 }
  0xf1   :  { %v142_v11 = vsel %vm138_vm0, 1, %v3620_v0 }
  0xf2   :  { %v144_v12 = vcombine.high %v142_v11, %v142_v11  ;;  %v151_v13 = vrot.slane %v142_v11, %v3806_v9 }
  0xf3   :  { %v137_v14 = vpop.permute.xlu0 %136 }
  0xf4   :  { %v158_v15 = vrot.slane %v144_v12, %v3806_v9  ;;  %v159_v16 = vcombine.high %v151_v13, %v151_v13  ;;  %v167_v17 = vrot.slane %v151_v13, %v3806_v9  ;;  %vm139_vm1 = vcmp.eq.s32.totalorder %v3803_v8, %v137_v14 }
  0xf5   :  { %v143_v19 = vsel %vm139_vm1, 1, %v3620_v0 }
  0xf6   :  { %v3817_v20 = vrot.slane %v158_v15, %v3806_v9  ;;  %v181_v21 = vrot.slane %v159_v16, %v3806_v9  ;;  %v193_v22 = vcombine.high %v143_v19, %v143_v19  ;;  %v200_v23 = vrot.slane %v143_v19, %v3806_v9 }
  0xf7   :  { %vm242_vm2 = vcmp.ne.s32.totalorder %v167_v17, 0  ;;  %v189_v44 = vcombine.high %v167_v17, %v167_v17  ;;  %v160_v51 = vcombine.high %v158_v15, %v158_v15 }
  0xf8   :  { %v2793_v25 = vsel %vm242_vm2, 1.0, %v3622_v24  ;;  %vm243_vm3 = vcmp.ne.s32.totalorder %v181_v21, 0  ;;  %v207_v26 = vrot.slane %v193_v22, %v3806_v9  ;;  %v216_v27 = vrot.slane %v200_v23, %v3806_v9 }
  0xf9   :  { %v309_v29 = vrot.slane %v2793_v25, %v3814_v18  ;;  %v2794_v30 = vsel %vm243_vm3, 1.0, %v3622_v24  ;;  %vm246_vm4 = vcmp.ne.s32.totalorder %v3817_v20, 0  ;;  %v191_v34 = vcombine.high %v181_v21, %v181_v21 }
  0xfa   :  { %v223_v31 = vrot.slane %v207_v26, %v3806_v9  ;;  %v238_v32 = vcombine.high %v216_v27, %v216_v27  ;;  %v208_v35 = vcombine.high %v200_v23, %v200_v23  ;;  %v313_v37 = vrot.slane %v2794_v30, %v3814_v18 }
  0xfb   :  { %v386_v36 = vmul.f32 %v309_v29, %v3827_v28  ;;  %vm250_vm6 = vcmp.ne.s32.totalorder %v216_v27, 0  ;;  %v2797_v39 = vsel %vm246_vm4, 1.0, %v3622_v24  ;;  %v387_v42 = vmul.f32 %v309_v29, %v3836_v33 }
  0xfc   :  { %vm252_vm7 = vcmp.ne.s32.totalorder %v238_v32, 0  ;;  %v2801_v38 = vsel %vm250_vm6, 1.0, %v3622_v24  ;;  %vm254_vm8 = vcmp.ne.s32.totalorder %v223_v31, 0  ;;  %v388_v41 = vmul.f32 %v313_v37, %v3827_v28 }
  0xfd   :  { %v419_v40 = vsel %vm418_vm5, %v386_v36, 0.0  ;;  %v2803_v43 = vsel %vm252_vm7, 1.0, %v3622_v24  ;;  %v341_v46 = vrot.slane %v2801_v38, %v3814_v18  ;;  %vm245_vm9 = vcmp.ne.s32.totalorder %v191_v34, 0 }
  0xfe   :  { %420 = vadd.xlane.f32.xlu1 %v419_v40  ;;  %v3847_v45 = vrot.slane %v2803_v43, %v3814_v18  ;;  %v230_v47 = vrot.slane %v208_v35, %v3806_v9  ;;  %v425_v48 = vsel %vm418_vm5, %v388_v41, 0.0  ;;  %v3853_v49 = vrot.slane %v2797_v39, %v3814_v18 }
  0xff   :  { %v2805_v50 = vsel %vm254_vm8, 1.0, %v3622_v24  ;;  %426 = vadd.xlane.f32.xlu0 %v425_v48  ;;  %v422_v53 = vsel %vm418_vm5, %v387_v42, 0.0  ;;  %v402_v54 = vmul.f32 %v341_v46, %v3827_v28  ;;  %v2796_v57 = vsel %vm245_vm9, 1.0, %v3622_v24 }
 0x100   :  { %v407_v52 = vmul.f32 %v3847_v45, %v3836_v33  ;;  %v3862_v56 = vrot.slane %v2805_v50, %v3814_v18  ;;  %v395_v58 = vmul.f32 %v3853_v49, %v3836_v33  ;;  %vm244_vm10 = vcmp.ne.s32.totalorder %v189_v44, 0 }
 0x101   :  { %v240_v59 = vcombine.high %v230_v47, %v230_v47  ;;  %v209_v60 = vcombine.high %v207_v26, %v207_v26  ;;  %v188_v61 = vrot.slane %v160_v51, %v3806_v9  ;;  %v467_v62 = vsel %vm418_vm5, %v402_v54, 0.0 }
 0x102   :  { %423 = vadd.xlane.f32.xlu1 %v422_v53  ;;  %v482_v55 = vsel %vm418_vm5, %v407_v52, 0.0  ;;  %v403_v63 = vmul.f32 %v341_v46, %v3836_v33  ;;  %v3871_v0 = vrot.slane %v2796_v57, %v3814_v18  ;;  %v411_v1 = vmul.f32 %v3862_v56, %v3836_v33 }
 0x103   :  { %483 = vadd.xlane.f32.xlu0 %v482_v55  ;;  %vm253_vm11 = vcmp.ne.s32.totalorder %v240_v59, 0  ;;  %v2795_v2 = vsel %vm244_vm10, 1.0, %v3622_v24  ;;  %v446_v3 = vsel %vm418_vm5, %v395_v58, 0.0  ;;  %v190_v4 = vcombine.high %v3817_v20, %v3817_v20 }
 0x104   :  { %v2804_v5 = vsel %vm253_vm11, 1.0, %v3622_v24  ;;  %vm247_vm12 = vcmp.ne.s32.totalorder %v188_v61, 0  ;;  %v237_v6 = vrot.slane %v209_v60, %v3806_v9  ;;  %v239_v10 = vcombine.high %v223_v31, %v223_v31 }
 0x105   :  { %v470_v11 = vsel %vm418_vm5, %v403_v63, 0.0  ;;  %v389_v12 = vmul.f32 %v313_v37, %v3836_v33  ;;  %v393_v13 = vmul.f32 %v3871_v0, %v3836_v33  ;;  %v317_v14 = vrot.slane %v2795_v2, %v3814_v18 }
 0x106   :  { %468 = vadd.xlane.f32.xlu1 %v467_v62  ;;  %v494_v15 = vsel %vm418_vm5, %v411_v1, 0.0  ;;  %vm255_vm13 = vcmp.ne.s32.totalorder %v237_v6, 0  ;;  %vm256_vm14 = vcmp.ne.s32.totalorder %v239_v10, 0  ;;  %v3888_v16 = vrot.slane %v2804_v5, %v3814_v18 }
 0x107   :  { %447 = vadd.xlane.f32.xlu0 %v446_v3  ;;  %v2798_v9 = vsel %vm247_vm12, 1.0, %v3622_v24  ;;  %vm251_vm15 = vcmp.ne.s32.totalorder %v230_v47, 0  ;;  %vm248_vm0 = vcmp.ne.s32.totalorder %v190_v4, 0  ;;  %v2806_v17 = vsel %vm255_vm13, 1.0, %v3622_v24 }
 0x108   :  { %v2807_v19 = vsel %vm256_vm14, 1.0, %v3622_v24  ;;  %v428_v20 = vsel %vm418_vm5, %v389_v12, 0.0  ;;  %v440_v21 = vsel %vm418_vm5, %v393_v13, 0.0  ;;  %v390_v22 = vmul.f32 %v317_v14, %v3827_v28 }
 0x109   :  { %v192_v23 = vcombine.high %v188_v61, %v188_v61  ;;  %v3897_v25 = vrot.slane %v2798_v9, %v3814_v18  ;;  %v2802_v26 = vsel %vm251_vm15, 1.0, %v3622_v24  ;;  %v2799_v27 = vsel %vm248_vm0, 1.0, %v3622_v24 }
 0x10a   :  { %471 = vadd.xlane.f32.xlu1 %v470_v11  ;;  %v241_v29 = vcombine.high %v237_v6, %v237_v6  ;;  %v409_v30 = vmul.f32 %v3888_v16, %v3836_v33  ;;  %v361_v31 = vrot.slane %v2806_v17, %v3814_v18  ;;  %v365_v32 = vrot.slane %v2807_v19, %v3814_v18 }
 0x10b   :  { %495 = vadd.xlane.f32.xlu0 %v494_v15  ;;  %vm249_vm1 = vcmp.ne.s32.totalorder %v192_v23, 0  ;;  %v391_v34 = vmul.f32 %v317_v14, %v3836_v33  ;;  %v431_v36 = vsel %vm418_vm5, %v390_v22, 0.0  ;;  %v345_v37 = vrot.slane %v2802_v26, %v3814_v18  ;;  %v515_v22 = vld [vmem:[#allocation7] sm:$0xff]  ;;  %v516_v23 = vld [vmem:[#allocation7 + $0x8] sm:$0xff] }
 0x10c   :  { %v2800_v35 = vsel %vm249_vm1, 1.0, %v3622_v24  ;;  %vm257_vm2 = vcmp.ne.s32.totalorder %v241_v29, 0  ;;  %v397_v40 = vmul.f32 %v3897_v25, %v3836_v33  ;;  %v333_v41 = vrot.slane %v2799_v27, %v3814_v18  ;;  %v520_v27 = vld [vmem:[%s4402_s5 + $0x18] sm:$0xff] }
 0x10d   :  { %v337_v38 = vrot.slane %v2800_v35, %v3814_v18  ;;  %v2808_v39 = vsel %vm257_vm2, 1.0, %v3622_v24  ;;  %v488_v43 = vsel %vm418_vm5, %v409_v30, 0.0  ;;  %v412_v44 = vmul.f32 %v361_v31, %v3827_v28  ;;  %v808_v30 = vld [vmem:[#allocation5] sm:$0x3] }
 0x10e   :  { %429 = vadd.xlane.f32.xlu1 %v428_v20  ;;  %v369_v42 = vrot.slane %v2808_v39, %v3814_v18  ;;  %v414_v46 = vmul.f32 %v365_v32, %v3827_v28  ;;  %v434_v48 = vsel %vm418_vm5, %v391_v34, 0.0  ;;  %v404_v51 = vmul.f32 %v345_v37, %v3827_v28  ;;  %v518_v20 = vld [vmem:[%s4402_s5 + $0x8] sm:$0xff] }
 0x10f   :  { %441 = vadd.xlane.f32.xlu0 %v440_v21  ;;  %v400_v47 = vmul.f32 %v337_v38, %v3827_v28  ;;  %v497_v52 = vsel %vm418_vm5, %v412_v44, 0.0  ;;  %v452_v55 = vsel %vm418_vm5, %v397_v40, 0.0  ;;  %v399_v57 = vmul.f32 %v333_v41, %v3836_v33 }
 0x110   :  { %v416_v50 = vmul.f32 %v369_v42, %v3827_v28  ;;  %v503_v53 = vsel %vm418_vm5, %v414_v46, 0.0  ;;  %v473_v58 = vsel %vm418_vm5, %v404_v51, 0.0  ;;  %v405_v59 = vmul.f32 %v345_v37, %v3836_v33 }
 0x111   :  { %v461_v18 = vsel %vm418_vm5, %v400_v47, 0.0  ;;  %v458_v60 = vsel %vm418_vm5, %v399_v57, 0.0  ;;  %v413_v61 = vmul.f32 %v361_v31, %v3836_v33  ;;  %v406_v63 = vmul.f32 %v3847_v45, %v3827_v28  ;;  %v807_v31 = vld [vmem:[#allocation2] sm:$0x3] }
 0x112   :  { %432 = vadd.xlane.f32.xlu1 %v431_v36  ;;  %v509_v54 = vsel %vm418_vm5, %v416_v50, 0.0  ;;  %v476_v62 = vsel %vm418_vm5, %v405_v59, 0.0  ;;  %v415_v2 = vmul.f32 %v365_v32, %v3836_v33  ;;  %v394_v4 = vmul.f32 %v3853_v49, %v3827_v28 }
 0x113   :  { %489 = vadd.xlane.f32.xlu0 %v488_v43  ;;  %v500_v1 = vsel %vm418_vm5, %v413_v61, 0.0  ;;  %v479_v3 = vsel %vm418_vm5, %v406_v63, 0.0  ;;  %v401_v6 = vmul.f32 %v337_v38, %v3836_v33  ;;  %v410_v45 = vmul.f32 %v3862_v56, %v3827_v28 }
 0x114   :  { %v506_v5 = vsel %vm418_vm5, %v415_v2, 0.0  ;;  %v443_v10 = vsel %vm418_vm5, %v394_v4, 0.0  ;;  %v417_v12 = vmul.f32 %v369_v42, %v3836_v33  ;;  %v392_v49 = vmul.f32 %v3871_v0, %v3827_v28 }
 0x115   :  { %v464_v11 = vsel %vm418_vm5, %v401_v6, 0.0  ;;  %v491_v13 = vsel %vm418_vm5, %v410_v45, 0.0  ;;  %v408_v56 = vmul.f32 %v3888_v16, %v3827_v28  ;;  %v396_v33 = vmul.f32 %v3897_v25, %v3827_v28  ;;  %v517_v16 = vld [vmem:[%s4402_s5] sm:$0xff]  ;;  %v519_v25 = vld [vmem:[%s4402_s5 + $0x10] sm:$0xff] }
 0x116   :  { %435 = vadd.xlane.f32.xlu1 %v434_v48  ;;  %v512_v14 = vsel %vm418_vm5, %v417_v12, 0.0  ;;  %v437_v15 = vsel %vm418_vm5, %v392_v49, 0.0  ;;  %v398_v0 = vmul.f32 %v333_v41, %v3827_v28  ;;  %v3623_v21 = vmov 0.0|0.0  }
 0x117   :  { %453 = vadd.xlane.f32.xlu0 %v452_v55  ;;  %v485_v9 = vsel %vm418_vm5, %v408_v56, 0.0  ;;  %v449_v17 = vsel %vm418_vm5, %v396_v33, 0.0  ;;  %3139 = vmatprep.subr.bf16.mxu1 %v3623_v21  ;;  %v3967_v28 = vpack.c.bf16 %v518_v20, %v517_v16  ;;  %v3135_v26 = vpack.c.bf16 %v516_v23, %v515_v22 }
 0x118   :  { %v455_v19 = vsel %vm418_vm5, %v398_v0, 0.0  ;;  %v3977_v29 = vpack.c.bf16 %v520_v27, %v519_v25  ;;  %vm3624_vm3 = vmmov 0   ;;  %vm809_vm4 = vcmask 261120  }
 0x119   :  { %3141 = vmatpush3.bf16.msra.mxu1 %v3967_v28  ;;  %3136 = vmatprep.subr.bf16.mxu0 %v3135_v26  ;;  %v564_v55 = vadd.s32 4294967288, %v3803_v8  ;;  %v4016_v61 = vsub.s32 %v3803_v8, %v3801_v7  ;;  %vm569_vm5 = vcmask 130112   ;;  %vm706_vm6 = vcmask 1041409  }
 0x11a   :  { %474 = vadd.xlane.f32.xlu1 %v473_v58  ;;  %3142 = vmatprep.subr.bf16.mxu1 %v3623_v21  ;;  %vm708_vm7 = vcmask 1042434   ;;  %vm710_vm8 = vcmask 1043459   ;;  %vm712_vm9 = vcmask 1044484   ;;  %vm714_vm10 = vcmask 1045509  }
 0x11b   :  { %459 = vadd.xlane.f32.xlu0 %v458_v60  ;;  %2945 = vmatprep.mubr.msk.f32.mxu1 %vm3624_vm3, %v3622_v24  ;;  %v4010_v58 = vsub.s32 %v564_v55, %v3801_v7  ;;  %vm716_vm11 = vcmask 1046534   ;;  %vm718_vm12 = vcmask 1047559   ;;  %vm727_vm13 = vcmask 130048  }
 0x11c   :  { %3138 = vmatpush3.bf16.msra.mxu0 %v3135_v26  ;;  %vm1667_vm14 = vcmask 1041408   ;;  %vm1669_vm15 = vcmask 1043456   ;;  %vm1671_vm0 = vcmask 1045504   ;;  %vm1660_vm1 = vcmask 261126  }
 0x11d   :  { %3144 = vmatpush3.bf16.msra.mxu1 %v3977_v29  ;;  %3145 = vmatprep.subr.bf16.mxu0 %v3623_v21 }
 0x11e   :  { %477 = vadd.xlane.f32.xlu1 %v476_v62  ;;  %3151 = vmatprep.subr.bf16.mxu1 %v3623_v21 }
 0x11f   :  { %501 = vadd.xlane.f32.xlu0 %v500_v1 }
 0x120   :  { %2946 = vmatmul.mubr.msk.f32.vlgmr.msra.gmra.mrb[0].mxu1 %vm809_vm4, %v807_v31 }
 0x121   :  { %3153 = vmatpush3.bf16.msra.mxu1 %v3967_v28  ;;  %2967 = vmatprep.mubr.msk.f32.mxu1 %vm3624_vm3, %v3622_v24 }
 0x122   :  { %480 = vadd.xlane.f32.xlu1 %v479_v3  ;;  %3154 = vmatprep.subr.bf16.mxu1 %v3623_v21 }
 0x123   :  { %507 = vadd.xlane.f32.xlu0 %v506_v5 }
 0x125   :  { %3156 = vmatpush3.bf16.msra.mxu1 %v3977_v29 }
 0x126   :  { %444 = vadd.xlane.f32.xlu1 %v443_v10  ;;  %3163 = vmatprep.subr.bf16.mxu1 %v3623_v21 }
 0x127   :  { %465 = vadd.xlane.f32.xlu0 %v464_v11 }
 0x12a   :  { %492 = vadd.xlane.f32.xlu1 %v491_v13 }
 0x12b   :  { %513 = vadd.xlane.f32.xlu0 %v512_v14 }
 0x12e   :  { %438 = vadd.xlane.f32.xlu1 %v437_v15 }
 0x132   :  { %486 = vadd.xlane.f32.xlu1 %v485_v9 }
 0x136   :  { %450 = vadd.xlane.f32.xlu1 %v449_v17 }
 0x13a   :  { %456 = vadd.xlane.f32.xlu1 %v455_v19 }
 0x13e   :  { %498 = vadd.xlane.f32.xlu1 %v497_v52 }
 0x141   :  { %892 = vrot.lane.b32.xlu0 %v808_v30, %s3611_s23 }
 0x142   :  { %504 = vadd.xlane.f32.xlu1 %v503_v53 }
 0x146   :  { %462 = vadd.xlane.f32.xlu1 %v461_v18 }
 0x14a   :  { %510 = vadd.xlane.f32.xlu1 %v509_v54 }
 0x18b   :  { %v421_v32 = vpop.xlane.xlu1 %420 }
 0x18c   :  { %v427_v35 = vpop.xlane.xlu0 %426  ;;  %v563_v2 = vrot.slane %v421_v32, %v4016_v61 }
 0x18d   :  { %v574_v5 = vrot.slane %v427_v35, %v4016_v61 }
 0x18f   :  { %v424_v34 = vpop.xlane.xlu1 %423 }
 0x190   :  { %v3996_v38 = vpop.xlane.xlu0 %483  ;;  %v568_v62 = vrot.slane %v424_v34, %v4010_v58 }
 0x191   :  { %v659_v11 = vrot.slane %v3996_v38, %v4010_v58 }
 0x192   :  { %v570_v8 = vsel %vm569_vm5, %v568_v62, %v563_v2 }
 0x193   :  { %v3992_v36 = vpop.xlane.xlu1 %468 }
 0x194   :  { %v3998_v40 = vpop.xlane.xlu0 %447  ;;  %v637_v14 = vrot.slane %v3992_v36, %v4016_v61 }
 0x195   :  { %v605_v33 = vrot.slane %v3998_v40, %v4010_v58 }
 0x197   :  { %v3994_v37 = vpop.xlane.xlu1 %471 }
 0x198   :  { %v4000_v43 = vpop.xlane.xlu0 %495  ;;  %v641_v12 = vrot.slane %v3994_v37, %v4010_v58 }
 0x19a   :  { %v642_v27 = vsel %vm569_vm5, %v641_v12, %v637_v14 }
 0x19b   :  { %v430_v39 = vpop.xlane.xlu1 %429 }
 0x19c   :  { %v442_v46 = vpop.xlane.xlu0 %441  ;;  %v578_v1 = vrot.slane %v430_v39, %v4010_v58 }
 0x19d   :  { %v596_v49 = vrot.slane %v442_v46, %v4010_v58 }
 0x19e   :  { %v579_v13 = vsel %vm569_vm5, %v578_v1, %v574_v5 }
 0x19f   :  { %v433_v41 = vpop.xlane.xlu1 %432  ;;  %v707_v16 = vsel %vm706_vm6, %v579_v13, %v570_v8 }
 0x1a0   :  { %v490_v50 = vpop.xlane.xlu0 %489  ;;  %v583_v6 = vrot.slane %v433_v41, %v4016_v61 }
 0x1a1   :  { %v668_v30 = vrot.slane %v490_v50, %v4010_v58 }
 0x1a3   :  { %v436_v42 = vpop.xlane.xlu1 %435 }
 0x1a4   :  { %v454_v52 = vpop.xlane.xlu0 %453  ;;  %v587_v3 = vrot.slane %v436_v42, %v4010_v58 }
 0x1a5   :  { %v614_v32 = vrot.slane %v454_v52, %v4010_v58 }
 0x1a6   :  { %v588_v15 = vsel %vm569_vm5, %v587_v3, %v583_v6 }
 0x1a7   :  { %v475_v44 = vpop.xlane.xlu1 %474  ;;  %v709_v31 = vsel %vm708_vm7, %v588_v15, %v707_v16 }
 0x1a8   :  { %v4006_v54 = vpop.xlane.xlu0 %459  ;;  %v646_v56 = vrot.slane %v475_v44, %v4016_v61 }
 0x1a9   :  { %v623_v34 = vrot.slane %v4006_v54, %v4010_v58  ;;  %v677_v54 = vrot.slane %v4000_v43, %v4010_v58 }
 0x1ab   :  { %v478_v47 = vpop.xlane.xlu1 %477 }
 0x1ac   :  { %v4012_v59 = vpop.xlane.xlu0 %501  ;;  %v650_v10 = vrot.slane %v478_v47, %v4010_v58 }
 0x1ad   :  { %v686_v35 = vrot.slane %v4012_v59, %v4010_v58 }
 0x1ae   :  { %v651_v20 = vsel %vm569_vm5, %v650_v10, %v646_v56 }
 0x1af   :  { %v481_v48 = vpop.xlane.xlu1 %480  ;;  %v720_v38 = vsel %vm706_vm6, %v651_v20, %v642_v27 }
 0x1b0   :  { %v4022_v4 = vpop.xlane.xlu0 %507  ;;  %v655_v9 = vrot.slane %v481_v48, %v4016_v61 }
 0x1b1   :  { %v695_v55 = vrot.slane %v4022_v4, %v4010_v58 }
 0x1b2   :  { %v660_v36 = vsel %vm569_vm5, %v659_v11, %v655_v9  ;;  %v2809_v11 = vld [vmem:[%s4403_s6] ss:$0 sm:$0xff] }
 0x1b3   :  { %v4002_v51 = vpop.xlane.xlu1 %444  ;;  %v721_v50 = vsel %vm708_vm7, %v660_v36, %v720_v38 }
 0x1b4   :  { %v601_v22 = vrot.slane %v4002_v51, %v4016_v61  ;;  %v466_v23 = vpop.xlane.xlu0 %465 }
 0x1b5   :  { %v632_v51 = vrot.slane %v466_v23, %v4010_v58 }
 0x1b6   :  { %v606_v42 = vsel %vm569_vm5, %v605_v33, %v601_v22 }
 0x1b7   :  { %v4004_v53 = vpop.xlane.xlu1 %492 }
 0x1b8   :  { %v673_v44 = vrot.slane %v4004_v53, %v4016_v61  ;;  %v514_v53 = vpop.xlane.xlu0 %513 }
 0x1b9   :  { %v704_v4 = vrot.slane %v514_v53, %v4010_v58 }
 0x1ba   :  { %v678_v1 = vsel %vm569_vm5, %v677_v54, %v673_v44 }
 0x1bb   :  { %v439_v18 = vpop.xlane.xlu1 %438 }
 0x1bc   :  { %v592_v7 = vrot.slane %v439_v18, %v4016_v61  ;;  %v893_v22 = vpop.permute.xlu0 %892 }
 0x1be   :  { %v597_v17 = vsel %vm569_vm5, %v596_v49, %v592_v7 }
 0x1bf   :  { %v487_v57 = vpop.xlane.xlu1 %486  ;;  %v711_v37 = vsel %vm710_vm8, %v597_v17, %v709_v31 }
 0x1c0   :  { %v664_v0 = vrot.slane %v487_v57, %v4016_v61  ;;  %v713_v18 = vsel %vm712_vm9, %v606_v42, %v711_v37 }
 0x1c2   :  { %v669_v39 = vsel %vm569_vm5, %v668_v30, %v664_v0 }
 0x1c3   :  { %v451_v60 = vpop.xlane.xlu1 %450  ;;  %v722_v57 = vsel %vm710_vm8, %v669_v39, %v721_v50 }
 0x1c4   :  { %v610_v19 = vrot.slane %v451_v60, %v4016_v61  ;;  %v723_v5 = vsel %vm712_vm9, %v678_v1, %v722_v57 }
 0x1c6   :  { %v615_v40 = vsel %vm569_vm5, %v614_v32, %v610_v19 }
 0x1c7   :  { %v457_v63 = vpop.xlane.xlu1 %456  ;;  %v715_v59 = vsel %vm714_vm10, %v615_v40, %v713_v18 }
 0x1c8   :  { %v619_v25 = vrot.slane %v457_v63, %v4016_v61 }
 0x1ca   :  { %v624_v48 = vsel %vm569_vm5, %v623_v34, %v619_v25 }
 0x1cb   :  { %v499_v45 = vpop.xlane.xlu1 %498  ;;  %v717_v63 = vsel %vm716_vm11, %v624_v48, %v715_v59 }
 0x1cc   :  { %v682_v41 = vrot.slane %v499_v45, %v4016_v61 }
 0x1ce   :  { %v687_v60 = vsel %vm569_vm5, %v686_v35, %v682_v41 }
 0x1cf   :  { %v505_v26 = vpop.xlane.xlu1 %504  ;;  %v724_v8 = vsel %vm714_vm10, %v687_v60, %v723_v5 }
 0x1d0   :  { %v691_v46 = vrot.slane %v505_v26, %v4016_v61 }
 0x1d2   :  { %v696_v2 = vsel %vm569_vm5, %v695_v55, %v691_v46 }
 0x1d3   :  { %v463_v47 = vpop.xlane.xlu1 %462  ;;  %v725_v10 = vsel %vm716_vm11, %v696_v2, %v724_v8 }
 0x1d4   :  { %v628_v52 = vrot.slane %v463_v47, %v4016_v61 }
 0x1d6   :  { %v633_v62 = vsel %vm569_vm5, %v632_v51, %v628_v52 }
 0x1d7   :  { %v511_v3 = vpop.xlane.xlu1 %510  ;;  %v719_v43 = vsel %vm718_vm12, %v633_v62, %v717_v63 }
 0x1d8   :  { %v700_v7 = vrot.slane %v511_v3, %v4016_v61  ;;  %2934 = vmatprep.mubr.msk.f32.mxu0 %vm727_vm13, %v719_v43 }
 0x1da   :  { %v705_v6 = vsel %vm569_vm5, %v704_v4, %v700_v7 }
 0x1db   :  { %v726_v45 = vsel %vm718_vm12, %v705_v6, %v725_v10 }
 0x1dc   :  { %2935 = vmatmul.mubr.msk.f32.vlgmr.msra.gmra.mrb[0].mxu0 %vm727_vm13, %v726_v45 }
 0x1dd   :  { %3147 = vmatpush3.bf16.msra.mxu0 %v3967_v28  ;;  %2956 = vmatprep.mubr.msk.f32.mxu0 %vm3624_vm3, %v3622_v24 }
 0x1de   :  { %3148 = vmatprep.subr.bf16.mxu0 %v3623_v21 }
 0x1e1   :  { %3150 = vmatpush3.bf16.msra.mxu0 %v3977_v29 }
 0x1e2   :  { %3157 = vmatprep.subr.bf16.mxu0 %v3623_v21 }
 0x1f3   :  { %v879_v58 = vpop.f32.mrb[0].mxu1 }
 0x1f4   :  { %v2947_v61 = vpop.f32.mrb[1].mxu1 }
 0x2af   :  { %v2936_v12 = vpop.f32.mrb[0].mxu0 }
 0x2b0   :  { %v4103_v13 = vadd.f32 %v2936_v12, %v2809_v11  ;;  %v798_v49 = vpop.f32.mrb[1].mxu0 }
 0x2b1   :  { %v4105_v14 = vadd.f32 %v2809_v11, %v798_v49 }
 0x2b3   :  { %v883_v15 = vadd.f32 %v879_v58, %v4105_v14 }
 0x2b5   :  { %3272 = vtanh.f32 %v883_v15  ;;  %v884_v9 = vsub.f32 0.0, %v883_v15 }
 0x2b7   :  { %v885_v33 = vmul.f32 1.442695, %v884_v9 }
 0x2b9   :  { %3274 = vpow2.f32 %v885_v33 }
 0x2bf   :  { %v3273_v56 = vpop.eup %3272 }
 0x2c0   :  { %897 = vrot.lane.b32.xlu1 %v3273_v56, %s3625_s17 }
 0x2c3   :  { %v3275_v17 = vpop.eup %3274 }
 0x2c4   :  { %v887_v0 = vadd.f32 1.0, %v3275_v17 }
 0x2c6   :  { %3276 = vrcp.f32 %v887_v0 }
 0x2d0   :  { %v3277_v19 = vpop.eup %3276 }
 0x2d1   :  { %v895_v23 = vmul.f32 %v3277_v19, %v893_v22 }
 0x332   :  { %v898_v16 = vpop.permute.xlu1 %897 }
 0x333   :  { %v900_v20 = vmul.f32 %v3277_v19, %v898_v16 }
 0x335   :  { %902 = vrot.lane.b32.xlu1 %v900_v20, %s3611_s23 }
 0x3a7   :  { %v903_v25 = vpop.permute.xlu1 %902 }
 0x3a8   :  { %v905_v26 = vadd.f32 %v903_v25, %v895_v23 }
 0x3aa   :  { %3278 = vtanh.f32 %v905_v26  ;;  %v999_v48 = vrot.slane %v905_v26, 6 }
 0x3b4   :  { %v3279_v27 = vpop.eup %3278 }
 0x3b5   :  { %908 = vrot.lane.b32.xlu1 %v3279_v27, %s3625_s17 }
 0x427   :  { %v909_v30 = vpop.permute.xlu1 %908 }
 0x428   :  { %v4111_v31 = vmul.f32 %v3277_v19, %v909_v30 }
 0x42a   :  { %913 = vrot.lane.b32.xlu0 %v4111_v31, %s3611_s23 }
 0x49c   :  { %v914_v32 = vpop.permute.xlu0 %913 }
 0x49d   :  { %2957 = vmatmul.mubr.msk.f32.vlgmr.msra.gmra.mrb[2].mxu0 %vm809_vm4, %v914_v32 }
 0x49e   :  { %3159 = vmatpush3.bf16.msra.mxu0 %v3967_v28  ;;  %2978 = vmatprep.mubr.msk.f32.mxu0 %vm3624_vm3, %v3622_v24 }
 0x49f   :  { %3160 = vmatprep.subr.bf16.mxu0 %v3623_v21 }
 0x4a2   :  { %3162 = vmatpush3.bf16.msra.mxu0 %v3977_v29 }
 0x4a3   :  { %3169 = vmatprep.subr.bf16.mxu0 %v3623_v21 }
 0x570   :  { %v983_v34 = vpop.f32.mrb[2].mxu0 }
 0x571   :  { %v988_v35 = vrot.slane %v983_v34, 6  ;;  %v2958_v36 = vpop.f32.mrb[3].mxu0 }
 0x573   :  { %v990_v37 = vadd.f32 %v988_v35, %v4105_v14 }
 0x575   :  { %3280 = vtanh.f32 %v990_v37  ;;  %v991_v39 = vsub.f32 0.0, %v990_v37 }
 0x577   :  { %v992_v40 = vmul.f32 1.442695, %v991_v39 }
 0x579   :  { %3282 = vpow2.f32 %v992_v40 }
 0x57f   :  { %v3281_v38 = vpop.eup %3280 }
 0x580   :  { %1003 = vrot.lane.b32.xlu1 %v3281_v38, %s3625_s17 }
 0x583   :  { %v3283_v41 = vpop.eup %3282 }
 0x584   :  { %v994_v42 = vadd.f32 1.0, %v3283_v41 }
 0x586   :  { %3284 = vrcp.f32 %v994_v42 }
 0x590   :  { %v3285_v44 = vpop.eup %3284 }
 0x591   :  { %v1001_v50 = vmul.f32 %v3285_v44, %v999_v48 }
 0x5f2   :  { %v1004_v46 = vpop.permute.xlu1 %1003 }
 0x5f3   :  { %v1006_v47 = vmul.f32 %v3285_v44, %v1004_v46 }
 0x5f5   :  { %1008 = vrot.lane.b32.xlu0 %v1006_v47, %s3611_s23 }
 0x667   :  { %v1009_v51 = vpop.permute.xlu0 %1008 }
 0x668   :  { %v1011_v52 = vadd.f32 %v1009_v51, %v1001_v50 }
 0x66a   :  { %3286 = vtanh.f32 %v1011_v52  ;;  %v1106_v6 = vrot.slane %v1011_v52, 6 }
 0x674   :  { %v3287_v18 = vpop.eup %3286 }
 0x675   :  { %1014 = vrot.lane.b32.xlu1 %v3287_v18, %s3625_s17 }
 0x6e7   :  { %v1015_v54 = vpop.permute.xlu1 %1014 }
 0x6e8   :  { %v1017_v55 = vmul.f32 %v3285_v44, %v1015_v54 }
 0x6ea   :  { %v1019_v53 = vrot.slane %v1017_v55, 2  ;;  %v1668_v49 = vsel %vm1667_vm14, %v4111_v31, %v1017_v55 }
 0x6ec   :  { %1020 = vrot.lane.b32.xlu0 %v1019_v53, %s3611_s23 }
 0x75e   :  { %v1021_v57 = vpop.permute.xlu0 %1020 }
 0x75f   :  { %2968 = vmatmul.mubr.msk.f32.vlgmr.msra.gmra.mrb[2].mxu1 %vm809_vm4, %v1021_v57 }
 0x760   :  { %3165 = vmatpush3.bf16.msra.mxu1 %v3967_v28  ;;  %2989 = vmatprep.mubr.msk.f32.mxu1 %vm3624_vm3, %v3622_v24 }
 0x761   :  { %3166 = vmatprep.subr.bf16.mxu1 %v3623_v21 }
 0x764   :  { %3168 = vmatpush3.bf16.msra.mxu1 %v3977_v29 }
 0x765   :  { %3175 = vmatprep.subr.bf16.mxu1 %v3623_v21 }
 0x832   :  { %v1090_v59 = vpop.f32.mrb[2].mxu1 }
 0x833   :  { %v1095_v60 = vrot.slane %v1090_v59, 4  ;;  %v2969_v62 = vpop.f32.mrb[3].mxu1 }
 0x835   :  { %v1097_v63 = vadd.f32 %v1095_v60, %v4105_v14 }
 0x837   :  { %3288 = vtanh.f32 %v1097_v63  ;;  %v1098_v2 = vsub.f32 0.0, %v1097_v63 }
 0x839   :  { %v1099_v3 = vmul.f32 1.442695, %v1098_v2 }
 0x83b   :  { %3290 = vpow2.f32 %v1099_v3 }
 0x841   :  { %v3289_v1 = vpop.eup %3288 }
 0x842   :  { %1110 = vrot.lane.b32.xlu1 %v3289_v1, %s3625_s17 }
 0x845   :  { %v3291_v43 = vpop.eup %3290 }
 0x846   :  { %v1101_v4 = vadd.f32 1.0, %v3291_v43 }
 0x848   :  { %3292 = vrcp.f32 %v1101_v4 }
 0x852   :  { %v3293_v5 = vpop.eup %3292 }
 0x853   :  { %v1108_v10 = vmul.f32 %v3293_v5, %v1106_v6 }
 0x8b4   :  { %v1111_v7 = vpop.permute.xlu1 %1110 }
 0x8b5   :  { %v1113_v8 = vmul.f32 %v3293_v5, %v1111_v7 }
 0x8b7   :  { %1115 = vrot.lane.b32.xlu0 %v1113_v8, %s3611_s23 }
 0x929   :  { %v1116_v45 = vpop.permute.xlu0 %1115 }
 0x92a   :  { %v1118_v58 = vadd.f32 %v1116_v45, %v1108_v10 }
 0x92c   :  { %3294 = vtanh.f32 %v1118_v58  ;;  %v1213_v31 = vrot.slane %v1118_v58, 6 }
 0x936   :  { %v3295_v61 = vpop.eup %3294 }
 0x937   :  { %1121 = vrot.lane.b32.xlu1 %v3295_v61, %s3625_s17 }
 0x9a9   :  { %v1122_v11 = vpop.permute.xlu1 %1121 }
 0x9aa   :  { %v1124_v12 = vmul.f32 %v3293_v5, %v1122_v11 }
 0x9ac   :  { %v1126_v15 = vrot.slane %v1124_v12, 4  ;;  %v1670_v56 = vsel %vm1669_vm15, %v1668_v49, %v1124_v12 }
 0x9ae   :  { %1127 = vrot.lane.b32.xlu0 %v1126_v15, %s3611_s23 }
 0xa20   :  { %v1128_v9 = vpop.permute.xlu0 %1127 }
 0xa21   :  { %2979 = vmatmul.mubr.msk.f32.vlgmr.msra.gmra.mrb[4].mxu0 %vm809_vm4, %v1128_v9 }
 0xa22   :  { %3171 = vmatpush3.bf16.msra.mxu0 %v3967_v28  ;;  %3000 = vmatprep.mubr.msk.f32.mxu0 %vm3624_vm3, %v3622_v24 }
 0xa23   :  { %3172 = vmatprep.subr.bf16.mxu0 %v3623_v21 }
 0xa26   :  { %3174 = vmatpush3.bf16.msra.mxu0 %v3977_v29 }
 0xa27   :  { %3181 = vmatprep.subr.bf16.mxu0 %v3623_v21 }
 0xaf4   :  { %v1197_v33 = vpop.f32.mrb[4].mxu0 }
 0xaf5   :  { %v1202_v17 = vrot.slane %v1197_v33, 2  ;;  %v2980_v0 = vpop.f32.mrb[5].mxu0 }
 0xaf7   :  { %v1204_v19 = vadd.f32 %v1202_v17, %v4105_v14 }
 0xaf9   :  { %3296 = vtanh.f32 %v1204_v19  ;;  %v1205_v20 = vsub.f32 0.0, %v1204_v19 }
 0xafb   :  { %v1206_v22 = vmul.f32 1.442695, %v1205_v20 }
 0xafd   :  { %3298 = vpow2.f32 %v1206_v22 }
 0xb03   :  { %v3297_v16 = vpop.eup %3296 }
 0xb04   :  { %1217 = vrot.lane.b32.xlu1 %v3297_v16, %s3625_s17 }
 0xb07   :  { %v3299_v23 = vpop.eup %3298 }
 0xb08   :  { %v1208_v25 = vadd.f32 1.0, %v3299_v23 }
 0xb0a   :  { %3300 = vrcp.f32 %v1208_v25 }
 0xb14   :  { %v3301_v26 = vpop.eup %3300 }
 0xb15   :  { %v1215_v32 = vmul.f32 %v3301_v26, %v1213_v31 }
 0xb76   :  { %v1218_v27 = vpop.permute.xlu1 %1217 }
 0xb77   :  { %v1220_v30 = vmul.f32 %v3301_v26, %v1218_v27 }
 0xb79   :  { %1222 = vrot.lane.b32.xlu0 %v1220_v30, %s3611_s23 }
 0xbeb   :  { %v1223_v34 = vpop.permute.xlu0 %1222 }
 0xbec   :  { %v1225_v35 = vadd.f32 %v1223_v34, %v1215_v32 }
 0xbee   :  { %3302 = vtanh.f32 %v1225_v35  ;;  %v1317_v55 = vrot.slane %v1225_v35, 6 }
 0xbf8   :  { %v3303_v14 = vpop.eup %3302 }
 0xbf9   :  { %1228 = vrot.lane.b32.xlu1 %v3303_v14, %s3625_s17 }
 0xc6b   :  { %v1229_v36 = vpop.permute.xlu1 %1228 }
 0xc6c   :  { %v1231_v37 = vmul.f32 %v3301_v26, %v1229_v36 }
 0xc6e   :  { %v1233_v38 = vrot.slane %v1231_v37, 6  ;;  %v4154_v39 = vsel %vm1671_vm0, %v1670_v56, %v1231_v37 }
 0xc70   :  { %1234 = vrot.lane.b32.xlu0 %v1233_v38, %s3611_s23 }
 0xce2   :  { %v1235_v40 = vpop.permute.xlu0 %1234 }
 0xce3   :  { %2990 = vmatmul.mubr.msk.f32.vlgmr.msra.gmra.mrb[4].mxu1 %vm809_vm4, %v1235_v40 }
 0xce4   :  { %3177 = vmatpush3.bf16.msra.mxu1 %v3967_v28  ;;  %3011 = vmatprep.mubr.msk.f32.mxu1 %vm3624_vm3, %v3622_v24 }
 0xce5   :  { %3178 = vmatprep.subr.bf16.mxu1 %v3623_v21 }
 0xce8   :  { %3180 = vmatpush3.bf16.msra.mxu1 %v3977_v29 }
 0xdb6   :  { %v1304_v41 = vpop.f32.mrb[4].mxu1 }
 0xdb7   :  { %v1308_v42 = vadd.f32 %v1304_v41, %v4103_v13  ;;  %v2991_v44 = vpop.f32.mrb[5].mxu1 }
 0xdb9   :  { %3304 = vtanh.f32 %v1308_v42  ;;  %v1309_v47 = vsub.f32 0.0, %v1308_v42 }
 0xdbb   :  { %v1310_v48 = vmul.f32 1.442695, %v1309_v47 }
 0xdbd   :  { %3306 = vpow2.f32 %v1310_v48 }
 0xdc3   :  { %v3305_v46 = vpop.eup %3304 }
 0xdc4   :  { %1321 = vrot.lane.b32.xlu1 %v3305_v46, %s3625_s17 }
 0xdc7   :  { %v3307_v50 = vpop.eup %3306 }
 0xdc8   :  { %v1312_v51 = vadd.f32 1.0, %v3307_v50 }
 0xdca   :  { %3308 = vrcp.f32 %v1312_v51 }
 0xdd4   :  { %v3309_v52 = vpop.eup %3308 }
 0xdd5   :  { %v1319_v53 = vmul.f32 %v3309_v52, %v1317_v55 }
 0xe36   :  { %v1322_v18 = vpop.permute.xlu1 %1321 }
 0xe37   :  { %v1324_v54 = vmul.f32 %v3309_v52, %v1322_v18 }
 0xe39   :  { %1326 = vrot.lane.b32.xlu0 %v1324_v54, %s3611_s23 }
 0xeab   :  { %v1327_v57 = vpop.permute.xlu0 %1326 }
 0xeac   :  { %v1329_v59 = vadd.f32 %v1327_v57, %v1319_v53 }
 0xeae   :  { %3310 = vtanh.f32 %v1329_v59  ;;  %v1423_v58 = vrot.slane %v1329_v59, 6 }
 0xeb8   :  { %v3311_v60 = vpop.eup %3310 }
 0xeb9   :  { %1332 = vrot.lane.b32.xlu1 %v3311_v60, %s3625_s17 }
 0xf2b   :  { %v1333_v62 = vpop.permute.xlu1 %1332 }
 0xf2c   :  { %v4167_v63 = vmul.f32 %v3309_v52, %v1333_v62 }
 0xf2e   :  { %1337 = vrot.lane.b32.xlu0 %v4167_v63, %s3611_s23 }
 0xfa0   :  { %v1338_v1 = vpop.permute.xlu0 %1337 }
 0xfa1   :  { %3001 = vmatmul.mubr.msk.f32.vlgmr.msra.gmra.mrb[6].mxu0 %vm809_vm4, %v1338_v1 }
 0xfa2   :  { %3183 = vmatpush3.bf16.msra.mxu0 %v3967_v28  ;;  %3022 = vmatprep.mubr.msk.f32.mxu0 %vm3624_vm3, %v3622_v24 }
 0xfa3   :  { %3184 = vmatprep.subr.bf16.mxu0 %v3623_v21 }
 0xfa6   :  { %3186 = vmatpush3.bf16.msra.mxu0 %v3977_v29 }
 0xfa7   :  { %3195 = vmatprep.subr.bf16.mxu0 %v3623_v21 }
0x1074   :  { %v1407_v2 = vpop.f32.mrb[6].mxu0 }
0x1075   :  { %v1412_v3 = vrot.slane %v1407_v2, 6  ;;  %v3002_v43 = vpop.f32.mrb[7].mxu0  ;;  %v1676_v2 = vld [vmem:[#allocation8] sm:$0xff] }
0x1076   :  { %v1680_v43 = vld [vmem:[#allocation10] sm:$0xff] }
0x1077   :  { %v1414_v4 = vadd.f32 %v1412_v3, %v4103_v13  ;;  %v1677_v3 = vld [vmem:[#allocation8 + $0x8] sm:$0xff] }
0x1079   :  { %3312 = vtanh.f32 %v1414_v4  ;;  %v1415_v7 = vsub.f32 0.0, %v1414_v4  ;;  %v3187_v4 = vpack.c.bf16 %v1677_v3, %v1676_v2 }
0x107b   :  { %v1416_v28 = vmul.f32 1.442695, %v1415_v7  ;;  %v1678_v7 = vld [vmem:[#allocation8 + $0x10] sm:$0xff]  ;;  %3188 = vmatprep.subr.bf16.mxu1 %v3187_v4 }
0x107d   :  { %3314 = vpow2.f32 %v1416_v28  ;;  %v1679_v28 = vld [vmem:[#allocation8 + $0x18] sm:$0xff] }
0x1083   :  { %v3313_v5 = vpop.eup %3312 }
0x1084   :  { %1427 = vrot.lane.b32.xlu1 %v3313_v5, %s3625_s17  ;;  %v1681_v5 = vld [vmem:[#allocation10 + $0x8] sm:$0xff] }
0x1087   :  { %v3315_v8 = vpop.eup %3314 }
0x1088   :  { %v1418_v6 = vadd.f32 1.0, %v3315_v8  ;;  %v4206_v8 = vpack.c.bf16 %v1681_v5, %v1680_v43 }
0x108a   :  { %3316 = vrcp.f32 %v1418_v6  ;;  %v1682_v6 = vld [vmem:[#allocation10 + $0x10] sm:$0xff] }
0x1094   :  { %v3317_v10 = vpop.eup %3316 }
0x1095   :  { %v1425_v61 = vmul.f32 %v3317_v10, %v1423_v58  ;;  %v1777_v58 = vld [vmem:[#allocation2 + $0x2] sm:$0x3] }
0x10f6   :  { %v1428_v45 = vpop.permute.xlu1 %1427 }
0x10f7   :  { %v1430_v29 = vmul.f32 %v3317_v10, %v1428_v45 }
0x10f9   :  { %1432 = vrot.lane.b32.xlu0 %v1430_v29, %s3611_s23 }
0x116b   :  { %v1433_v11 = vpop.permute.xlu0 %1432 }
0x116c   :  { %v1435_v12 = vadd.f32 %v1433_v11, %v1425_v61 }
0x116e   :  { %3318 = vtanh.f32 %v1435_v12  ;;  %v1530_v32 = vrot.slane %v1435_v12, 6 }
0x1178   :  { %v3319_v49 = vpop.eup %3318 }
0x1179   :  { %1438 = vrot.lane.b32.xlu1 %v3319_v49, %s3625_s17  ;;  %v1779_v49 = vld [vmem:[#allocation5 + $0x2] sm:$0x3] }
0x11eb   :  { %v1439_v15 = vpop.permute.xlu1 %1438 }
0x11ec   :  { %v1441_v56 = vmul.f32 %v3317_v10, %v1439_v15  ;;  %v1683_v10 = vld [vmem:[#allocation10 + $0x18] sm:$0xff] }
0x11ed   :  { %v4209_v45 = vpack.c.bf16 %v1683_v10, %v1682_v6 }
0x11ee   :  { %v1443_v9 = vrot.slane %v1441_v56, 2  ;;  %v1673_v40 = vsel %vm1667_vm14, %v4167_v63, %v1441_v56 }
0x11f0   :  { %1444 = vrot.lane.b32.xlu0 %v1443_v9, %s3611_s23 }
0x1262   :  { %v1445_v33 = vpop.permute.xlu0 %1444 }
0x1263   :  { %3012 = vmatmul.mubr.msk.f32.vlgmr.msra.gmra.mrb[6].mxu1 %vm809_vm4, %v1445_v33  ;;  %v2820_v33 = vld [vmem:[%s4406_s9] ss:$0 sm:$0xff]  ;;  %s3626_s9 = smov 96  }
0x1264   :  { %3190 = vmatpush3.bf16.msra.mxu1 %v3187_v4 }
0x1336   :  { %v1514_v17 = vpop.f32.mrb[6].mxu1 }
0x1337   :  { %v1519_v0 = vrot.slane %v1514_v17, 4  ;;  %v3013_v19 = vpop.f32.mrb[7].mxu1 }
0x1339   :  { %v1521_v16 = vadd.f32 %v1519_v0, %v4103_v13 }
0x133b   :  { %3320 = vtanh.f32 %v1521_v16  ;;  %v1522_v22 = vsub.f32 0.0, %v1521_v16 }
0x133d   :  { %v1523_v23 = vmul.f32 1.442695, %v1522_v22 }
0x133f   :  { %3322 = vpow2.f32 %v1523_v23 }
0x1345   :  { %v3321_v20 = vpop.eup %3320 }
0x1346   :  { %1534 = vrot.lane.b32.xlu1 %v3321_v20, %s3625_s17 }
0x1349   :  { %v3323_v25 = vpop.eup %3322 }
0x134a   :  { %v1525_v26 = vadd.f32 1.0, %v3323_v25 }
0x134c   :  { %3324 = vrcp.f32 %v1525_v26 }
0x1356   :  { %v3325_v27 = vpop.eup %3324 }
0x1357   :  { %v1532_v34 = vmul.f32 %v3325_v27, %v1530_v32 }
0x13b8   :  { %v1535_v30 = vpop.permute.xlu1 %1534 }
0x13b9   :  { %v1537_v31 = vmul.f32 %v3325_v27, %v1535_v30 }
0x13bb   :  { %1539 = vrot.lane.b32.xlu0 %v1537_v31, %s3611_s23 }
0x142d   :  { %v1540_v35 = vpop.permute.xlu0 %1539 }
0x142e   :  { %v1542_v14 = vadd.f32 %v1540_v35, %v1532_v34 }
0x1430   :  { %3326 = vtanh.f32 %v1542_v14  ;;  %v1637_v60 = vrot.slane %v1542_v14, 6 }
0x143a   :  { %v3327_v36 = vpop.eup %3326 }
0x143b   :  { %1545 = vrot.lane.b32.xlu1 %v3327_v36, %s3625_s17 }
0x14ad   :  { %v1546_v37 = vpop.permute.xlu1 %1545 }
0x14ae   :  { %v1548_v38 = vmul.f32 %v3325_v27, %v1546_v37 }
0x14b0   :  { %v1550_v41 = vrot.slane %v1548_v38, 4  ;;  %v4191_v42 = vsel %vm1669_vm15, %v1673_v40, %v1548_v38 }
0x14b2   :  { %1551 = vrot.lane.b32.xlu0 %v1550_v41, %s3611_s23 }
0x1524   :  { %v1552_v44 = vpop.permute.xlu0 %1551 }
0x1525   :  { %3023 = vmatmul.mubr.msk.f32.vlgmr.msra.gmra.mrb[8].mxu0 %vm809_vm4, %v1552_v44 }
0x1526   :  { %3044 = vmatprep.mubr.msk.f32.mxu0 %vm3624_vm3, %v3622_v24  ;;  %3197 = vmatpush3.bf16.msra.mxu0 %v4206_v8 }
0x1527   :  { %3198 = vmatprep.subr.bf16.mxu0 %v3623_v21 }
0x152a   :  { %3200 = vmatpush3.bf16.msra.mxu0 %v4209_v45 }
0x152b   :  { %3207 = vmatprep.subr.bf16.mxu0 %v3623_v21 }
0x152d   :  { %3045 = vmatmul.mubr.msk.f32.vlgmr.msra.gmra.mrb[10].mxu0 %vm809_vm4, %v1777_v58 }
0x152e   :  { %3209 = vmatpush3.bf16.msra.mxu0 %v4206_v8  ;;  %3066 = vmatprep.mubr.msk.f32.mxu0 %vm3624_vm3, %v3622_v24 }
0x152f   :  { %3210 = vmatprep.subr.bf16.mxu0 %v3623_v21 }
0x1532   :  { %3212 = vmatpush3.bf16.msra.mxu0 %v4209_v45 }
0x1533   :  { %3219 = vmatprep.subr.bf16.mxu0 %v3623_v21 }
0x15f8   :  { %v1621_v46 = vpop.f32.mrb[8].mxu0 }
0x15f9   :  { %v1626_v47 = vrot.slane %v1621_v46, 2  ;;  %v3024_v48 = vpop.f32.mrb[9].mxu0 }
0x15fb   :  { %v1628_v50 = vadd.f32 %v1626_v47, %v4103_v13 }
0x15fd   :  { %3328 = vtanh.f32 %v1628_v50  ;;  %v1629_v52 = vsub.f32 0.0, %v1628_v50 }
0x15ff   :  { %v1630_v18 = vmul.f32 1.442695, %v1629_v52 }
0x1600   :  { %v1849_v56 = vpop.f32.mrb[10].mxu0 }
0x1601   :  { %3330 = vpow2.f32 %v1630_v18  ;;  %v3046_v9 = vpop.f32.mrb[11].mxu0 }
0x1607   :  { %v3329_v51 = vpop.eup %3328 }
0x1608   :  { %1641 = vrot.lane.b32.xlu1 %v3329_v51, %s3625_s17 }
0x160b   :  { %v3331_v54 = vpop.eup %3330 }
0x160c   :  { %v1632_v55 = vadd.f32 1.0, %v3331_v54 }
0x160e   :  { %3332 = vrcp.f32 %v1632_v55 }
0x1618   :  { %v3333_v53 = vpop.eup %3332 }
0x1619   :  { %v1639_v13 = vmul.f32 %v3333_v53, %v1637_v60 }
0x167a   :  { %v1642_v57 = vpop.permute.xlu1 %1641 }
0x167b   :  { %v1644_v59 = vmul.f32 %v3333_v53, %v1642_v57 }
0x167d   :  { %1646 = vrot.lane.b32.xlu0 %v1644_v59, %s3611_s23 }
0x1681   :  { %1693 = vrot.lane.b32.xlu0 %v4154_v39, %s3611_s23  ;;  %v3191_v39 = vpack.c.bf16 %v1679_v28, %v1678_v7 }
0x1683   :  { %3192 = vmatprep.subr.bf16.mxu1 %v3191_v39 }
0x1684   :  { %3194 = vmatpush3.bf16.msra.mxu1 %v3191_v39 }
0x1685   :  { %3201 = vmatprep.subr.bf16.mxu1 %v3623_v21 }
0x16ef   :  { %v1647_v62 = vpop.permute.xlu0 %1646 }
0x16f0   :  { %v4202_v63 = vadd.f32 %v1647_v62, %v1639_v13 }
0x16f2   :  { %3334 = vtanh.f32 %v4202_v63 }
0x16f3   :  { %v1694_v1 = vpop.permute.xlu0 %1693 }
0x16f4   :  { %3033 = vmatprep.mubr.msk.f32.mxu1 %vm809_vm4, %v1694_v1 }
0x16fc   :  { %v3335_v29 = vpop.eup %3334 }
0x16fd   :  { %1652 = vrot.lane.b32.xlu1 %v3335_v29, %s3625_s17 }
0x176f   :  { %v1653_v61 = vpop.permute.xlu1 %1652 }
0x1770   :  { %v4223_v11 = vmul.f32 %v3333_v53, %v1653_v61 }
0x1772   :  { %v1675_v12 = vsel %vm1671_vm0, %v4191_v42, %v4223_v11 }
0x1773   :  { %1695 = vrot.lane.b32.xlu1 %v1675_v12, %s3611_s23 }
0x1777   :  { %1862 = vrot.lane.b32.xlu1 %v1779_v49, %s3611_s23 }
0x17e5   :  { %v1696_v15 = vpop.permute.xlu1 %1695 }
0x17e6   :  { %3034 = vmatmul.mubr.msk.f32.vlgmr.msra.gmra.mrb[8].mxu1 %vm809_vm4, %v1696_v15 }
0x17e7   :  { %3203 = vmatpush3.bf16.msra.mxu1 %v4206_v8  ;;  %3055 = vmatprep.mubr.msk.f32.mxu1 %vm3624_vm3, %v3622_v24 }
0x17e8   :  { %3204 = vmatprep.subr.bf16.mxu1 %v3623_v21 }
0x17e9   :  { %v1863_v34 = vpop.permute.xlu1 %1862 }
0x17eb   :  { %3206 = vmatpush3.bf16.msra.mxu1 %v4209_v45 }
0x17ec   :  { %3213 = vmatprep.subr.bf16.mxu1 %v3623_v21 }
0x18b9   :  { %v3035_v17 = vpop.f32.mrb[8].mxu1 }
0x18ba   :  { %v4240_v0 = vadd.f32 %v3035_v17, %v2820_v33  ;;  %v1767_v19 = vpop.f32.mrb[9].mxu1 }
0x18bb   :  { %v4242_v16 = vadd.f32 %v2820_v33, %v1767_v19 }
0x18bd   :  { %v1853_v20 = vadd.f32 %v1849_v56, %v4242_v16 }
0x18bf   :  { %3336 = vtanh.f32 %v1853_v20  ;;  %v1854_v23 = vsub.f32 0.0, %v1853_v20 }
0x18c1   :  { %v1855_v25 = vmul.f32 1.442695, %v1854_v23 }
0x18c3   :  { %3338 = vpow2.f32 %v1855_v25 }
0x18c9   :  { %v3337_v22 = vpop.eup %3336 }
0x18ca   :  { %1867 = vrot.lane.b32.xlu0 %v3337_v22, %s3625_s17 }
0x18cd   :  { %v3339_v26 = vpop.eup %3338 }
0x18ce   :  { %v1857_v27 = vadd.f32 1.0, %v3339_v26 }
0x18d0   :  { %3340 = vrcp.f32 %v1857_v27 }
0x18da   :  { %v3341_v30 = vpop.eup %3340 }
0x18db   :  { %v1865_v35 = vmul.f32 %v3341_v30, %v1863_v34 }
0x193c   :  { %v1868_v31 = vpop.permute.xlu0 %1867 }
0x193d   :  { %v1870_v32 = vmul.f32 %v3341_v30, %v1868_v31 }
0x193f   :  { %1872 = vrot.lane.b32.xlu0 %v1870_v32, %s3611_s23 }
0x19b1   :  { %v1873_v14 = vpop.permute.xlu0 %1872 }
0x19b2   :  { %v1875_v36 = vadd.f32 %v1873_v14, %v1865_v35 }
0x19b4   :  { %3342 = vtanh.f32 %v1875_v36  ;;  %v1969_v57 = vrot.slane %v1875_v36, 6 }
0x19be   :  { %v3343_v37 = vpop.eup %3342 }
0x19bf   :  { %1878 = vrot.lane.b32.xlu1 %v3343_v37, %s3625_s17 }
0x1a31   :  { %v1879_v38 = vpop.permute.xlu1 %1878 }
0x1a32   :  { %v4248_v40 = vmul.f32 %v3341_v30, %v1879_v38 }
0x1a34   :  { %1883 = vrot.lane.b32.xlu0 %v4248_v40, %s3611_s23 }
0x1aa6   :  { %v1884_v41 = vpop.permute.xlu0 %1883 }
0x1aa7   :  { %3056 = vmatmul.mubr.msk.f32.vlgmr.msra.gmra.mrb[10].mxu1 %vm809_vm4, %v1884_v41 }
0x1aa8   :  { %3215 = vmatpush3.bf16.msra.mxu1 %v4206_v8  ;;  %3077 = vmatprep.mubr.msk.f32.mxu1 %vm3624_vm3, %v3622_v24 }
0x1aa9   :  { %3216 = vmatprep.subr.bf16.mxu1 %v3623_v21 }
0x1aac   :  { %3218 = vmatpush3.bf16.msra.mxu1 %v4209_v45 }
0x1aad   :  { %3225 = vmatprep.subr.bf16.mxu1 %v3623_v21 }
0x1b7a   :  { %v1953_v42 = vpop.f32.mrb[10].mxu1 }
0x1b7b   :  { %v1958_v44 = vrot.slane %v1953_v42, 6  ;;  %v3057_v46 = vpop.f32.mrb[11].mxu1 }
0x1b7d   :  { %v1960_v47 = vadd.f32 %v1958_v44, %v4242_v16 }
0x1b7f   :  { %3344 = vtanh.f32 %v1960_v47  ;;  %v1961_v50 = vsub.f32 0.0, %v1960_v47 }
0x1b81   :  { %v1962_v51 = vmul.f32 1.442695, %v1961_v50 }
0x1b83   :  { %3346 = vpow2.f32 %v1962_v51 }
0x1b89   :  { %v3345_v48 = vpop.eup %3344 }
0x1b8a   :  { %1973 = vrot.lane.b32.xlu1 %v3345_v48, %s3625_s17 }
0x1b8d   :  { %v3347_v52 = vpop.eup %3346 }
0x1b8e   :  { %v1964_v18 = vadd.f32 1.0, %v3347_v52 }
0x1b90   :  { %3348 = vrcp.f32 %v1964_v18 }
0x1b9a   :  { %v3349_v54 = vpop.eup %3348 }
0x1b9b   :  { %v1971_v59 = vmul.f32 %v3349_v54, %v1969_v57 }
0x1bfc   :  { %v1974_v55 = vpop.permute.xlu1 %1973 }
0x1bfd   :  { %v1976_v53 = vmul.f32 %v3349_v54, %v1974_v55 }
0x1bff   :  { %1978 = vrot.lane.b32.xlu0 %v1976_v53, %s3611_s23 }
0x1c71   :  { %v1979_v60 = vpop.permute.xlu0 %1978 }
0x1c72   :  { %v1981_v13 = vadd.f32 %v1979_v60, %v1971_v59 }
0x1c74   :  { %3350 = vtanh.f32 %v1981_v13  ;;  %v2076_v15 = vrot.slane %v1981_v13, 6 }
0x1c7e   :  { %v3351_v62 = vpop.eup %3350 }
0x1c7f   :  { %1984 = vrot.lane.b32.xlu1 %v3351_v62, %s3625_s17 }
0x1cf1   :  { %v1985_v1 = vpop.permute.xlu1 %1984 }
0x1cf2   :  { %v1987_v2 = vmul.f32 %v3349_v54, %v1985_v1 }
0x1cf4   :  { %v1989_v3 = vrot.slane %v1987_v2, 2  ;;  %v2638_v22 = vsel %vm1667_vm14, %v4248_v40, %v1987_v2 }
0x1cf6   :  { %1990 = vrot.lane.b32.xlu0 %v1989_v3, %s3611_s23 }
0x1d68   :  { %v1991_v43 = vpop.permute.xlu0 %1990 }
0x1d69   :  { %3067 = vmatmul.mubr.msk.f32.vlgmr.msra.gmra.mrb[12].mxu0 %vm809_vm4, %v1991_v43 }
0x1d6a   :  { %3221 = vmatpush3.bf16.msra.mxu0 %v4206_v8  ;;  %3088 = vmatprep.mubr.msk.f32.mxu0 %vm3624_vm3, %v3622_v24 }
0x1d6b   :  { %3222 = vmatprep.subr.bf16.mxu0 %v3623_v21 }
0x1d6e   :  { %3224 = vmatpush3.bf16.msra.mxu0 %v4209_v45 }
0x1d6f   :  { %3231 = vmatprep.subr.bf16.mxu0 %v3623_v21 }
0x1e3c   :  { %v2060_v4 = vpop.f32.mrb[12].mxu0 }
0x1e3d   :  { %v2065_v5 = vrot.slane %v2060_v4, 4  ;;  %v3068_v7 = vpop.f32.mrb[13].mxu0 }
0x1e3f   :  { %v2067_v28 = vadd.f32 %v2065_v5, %v4242_v16 }
0x1e41   :  { %3352 = vtanh.f32 %v2067_v28  ;;  %v2068_v6 = vsub.f32 0.0, %v2067_v28 }
0x1e43   :  { %v2069_v10 = vmul.f32 1.442695, %v2068_v6 }
0x1e45   :  { %3354 = vpow2.f32 %v2069_v10 }
0x1e4b   :  { %v3353_v39 = vpop.eup %3352 }
0x1e4c   :  { %2080 = vrot.lane.b32.xlu1 %v3353_v39, %s3625_s17 }
0x1e4f   :  { %v3355_v29 = vpop.eup %3354 }
0x1e50   :  { %v2071_v58 = vadd.f32 1.0, %v3355_v29 }
0x1e52   :  { %3356 = vrcp.f32 %v2071_v58 }
0x1e5c   :  { %v3357_v61 = vpop.eup %3356 }
0x1e5d   :  { %v2078_v56 = vmul.f32 %v3357_v61, %v2076_v15 }
0x1ebe   :  { %v2081_v12 = vpop.permute.xlu1 %2080 }
0x1ebf   :  { %v2083_v49 = vmul.f32 %v3357_v61, %v2081_v12 }
0x1ec1   :  { %2085 = vrot.lane.b32.xlu0 %v2083_v49, %s3611_s23 }
0x1f33   :  { %v2086_v9 = vpop.permute.xlu0 %2085 }
0x1f34   :  { %v2088_v33 = vadd.f32 %v2086_v9, %v2078_v56 }
0x1f36   :  { %3358 = vtanh.f32 %v2088_v33  ;;  %v2183_v42 = vrot.slane %v2088_v33, 6 }
0x1f40   :  { %v3359_v17 = vpop.eup %3358 }
0x1f41   :  { %2091 = vrot.lane.b32.xlu1 %v3359_v17, %s3625_s17 }
0x1fb3   :  { %v2092_v19 = vpop.permute.xlu1 %2091 }
0x1fb4   :  { %v2094_v20 = vmul.f32 %v3357_v61, %v2092_v19 }
0x1fb6   :  { %v2096_v23 = vrot.slane %v2094_v20, 4  ;;  %v2639_v25 = vsel %vm1669_vm15, %v2638_v22, %v2094_v20 }
0x1fb8   :  { %2097 = vrot.lane.b32.xlu0 %v2096_v23, %s3611_s23 }
0x202a   :  { %v2098_v26 = vpop.permute.xlu0 %2097 }
0x202b   :  { %3078 = vmatmul.mubr.msk.f32.vlgmr.msra.gmra.mrb[12].mxu1 %vm809_vm4, %v2098_v26 }
0x202c   :  { %3227 = vmatpush3.bf16.msra.mxu1 %v4206_v8  ;;  %3099 = vmatprep.mubr.msk.f32.mxu1 %vm3624_vm3, %v3622_v24 }
0x202d   :  { %3228 = vmatprep.subr.bf16.mxu1 %v3623_v21 }
0x2030   :  { %3230 = vmatpush3.bf16.msra.mxu1 %v4209_v45 }
0x2031   :  { %3237 = vmatprep.subr.bf16.mxu1 %v3623_v21 }
0x20fe   :  { %v2167_v27 = vpop.f32.mrb[12].mxu1 }
0x20ff   :  { %v2172_v30 = vrot.slane %v2167_v27, 2  ;;  %v3079_v31 = vpop.f32.mrb[13].mxu1 }
0x2101   :  { %v2174_v32 = vadd.f32 %v2172_v30, %v4242_v16 }
0x2103   :  { %3360 = vtanh.f32 %v2174_v32  ;;  %v2175_v35 = vsub.f32 0.0, %v2174_v32 }
0x2105   :  { %v2176_v14 = vmul.f32 1.442695, %v2175_v35 }
0x2107   :  { %3362 = vpow2.f32 %v2176_v14 }
0x210d   :  { %v3361_v34 = vpop.eup %3360 }
0x210e   :  { %2187 = vrot.lane.b32.xlu1 %v3361_v34, %s3625_s17 }
0x2111   :  { %v3363_v36 = vpop.eup %3362 }
0x2112   :  { %v2178_v37 = vadd.f32 1.0, %v3363_v36 }
0x2114   :  { %3364 = vrcp.f32 %v2178_v37 }
0x211e   :  { %v3365_v38 = vpop.eup %3364 }
0x211f   :  { %v2185_v44 = vmul.f32 %v3365_v38, %v2183_v42 }
0x2180   :  { %v2188_v40 = vpop.permute.xlu1 %2187 }
0x2181   :  { %v2190_v41 = vmul.f32 %v3365_v38, %v2188_v40 }
0x2183   :  { %2192 = vrot.lane.b32.xlu0 %v2190_v41, %s3611_s23 }
0x21f5   :  { %v2193_v46 = vpop.permute.xlu0 %2192 }
0x21f6   :  { %v2195_v47 = vadd.f32 %v2193_v46, %v2185_v44 }
0x21f8   :  { %3366 = vtanh.f32 %v2195_v47  ;;  %v2287_v43 = vrot.slane %v2195_v47, 6 }
0x2202   :  { %v3367_v16 = vpop.eup %3366 }
0x2203   :  { %2198 = vrot.lane.b32.xlu1 %v3367_v16, %s3625_s17 }
0x2275   :  { %v2199_v48 = vpop.permute.xlu1 %2198 }
0x2276   :  { %v2201_v50 = vmul.f32 %v3365_v38, %v2199_v48 }
0x2278   :  { %v2203_v51 = vrot.slane %v2201_v50, 6  ;;  %v4291_v52 = vsel %vm1671_vm0, %v2639_v25, %v2201_v50 }
0x227a   :  { %2204 = vrot.lane.b32.xlu0 %v2203_v51, %s3611_s23 }
0x22ec   :  { %v2205_v18 = vpop.permute.xlu0 %2204 }
0x22ed   :  { %3089 = vmatmul.mubr.msk.f32.vlgmr.msra.gmra.mrb[14].mxu0 %vm809_vm4, %v2205_v18 }
0x22ee   :  { %3233 = vmatpush3.bf16.msra.mxu0 %v4206_v8  ;;  %3110 = vmatprep.mubr.msk.f32.mxu0 %vm3624_vm3, %v3622_v24 }
0x22ef   :  { %3234 = vmatprep.subr.bf16.mxu0 %v3623_v21 }
0x22f2   :  { %3236 = vmatpush3.bf16.msra.mxu0 %v4209_v45 }
0x23c0   :  { %v2274_v54 = vpop.f32.mrb[14].mxu0 }
0x23c1   :  { %v2278_v55 = vadd.f32 %v2274_v54, %v4240_v0  ;;  %v3090_v53 = vpop.f32.mrb[15].mxu0 }
0x23c3   :  { %3368 = vtanh.f32 %v2278_v55  ;;  %v2279_v59 = vsub.f32 0.0, %v2278_v55 }
0x23c5   :  { %v2280_v60 = vmul.f32 1.442695, %v2279_v59 }
0x23c7   :  { %3370 = vpow2.f32 %v2280_v60 }
0x23cd   :  { %v3369_v57 = vpop.eup %3368 }
0x23ce   :  { %2291 = vrot.lane.b32.xlu1 %v3369_v57, %s3625_s17 }
0x23d1   :  { %v3371_v13 = vpop.eup %3370 }
0x23d2   :  { %v2282_v62 = vadd.f32 1.0, %v3371_v13 }
0x23d4   :  { %3372 = vrcp.f32 %v2282_v62 }
0x23de   :  { %v3373_v1 = vpop.eup %3372 }
0x23df   :  { %v2289_v4 = vmul.f32 %v3373_v1, %v2287_v43 }
0x2440   :  { %v2292_v2 = vpop.permute.xlu1 %2291 }
0x2441   :  { %v2294_v3 = vmul.f32 %v3373_v1, %v2292_v2 }
0x2443   :  { %2296 = vrot.lane.b32.xlu0 %v2294_v3, %s3611_s23 }
0x24b5   :  { %v2297_v5 = vpop.permute.xlu0 %2296 }
0x24b6   :  { %v2299_v7 = vadd.f32 %v2297_v5, %v2289_v4 }
0x24b8   :  { %3374 = vtanh.f32 %v2299_v7 }
0x24c2   :  { %v3375_v28 = vpop.eup %3374 }
0x24c3   :  { %2302 = vrot.lane.b32.xlu1 %v3375_v28, %s3625_s17 }
0x2535   :  { %v2303_v39 = vpop.permute.xlu1 %2302 }
0x2536   :  { %v4304_v6 = vmul.f32 %v3373_v1, %v2303_v39 }
0x2538   :  { %2307 = vrot.lane.b32.xlu0 %v4304_v6, %s3611_s23 }
0x25aa   :  { %v2308_v10 = vpop.permute.xlu0 %2307 }
0x25ab   :  { %3100 = vmatmul.mubr.msk.f32.vlgmr.msra.gmra.mrb[14].mxu1 %vm809_vm4, %v2308_v10 }
0x25ac   :  { %3239 = vmatpush3.bf16.msra.mxu1 %v4206_v8  ;;  %3121 = vmatprep.mubr.msk.f32.mxu1 %vm3624_vm3, %v3622_v24 }
0x25ad   :  { %3240 = vmatprep.subr.bf16.mxu1 %v3623_v21 }
0x25b0   :  { %3242 = vmatpush3.bf16.msra.mxu1 %v4209_v45  ;;  %v2393_v45 = vrot.slane %v2299_v7, 6 }
0x267e   :  { %v2377_v29 = vpop.f32.mrb[14].mxu1 }
0x267f   :  { %v2382_v58 = vrot.slane %v2377_v29, 6  ;;  %v3101_v61 = vpop.f32.mrb[15].mxu1 }
0x2680   :  { %v2645_v61 = vld [vmem:[#allocation11 + $0x8] sm:$0xff] }
0x2681   :  { %v2384_v12 = vadd.f32 %v2382_v58, %v4240_v0  ;;  %v2644_v58 = vld [vmem:[#allocation11] sm:$0xff] }
0x2683   :  { %3376 = vtanh.f32 %v2384_v12  ;;  %v2385_v15 = vsub.f32 0.0, %v2384_v12 }
0x2685   :  { %v2386_v56 = vmul.f32 1.442695, %v2385_v15 }
0x2687   :  { %3378 = vpow2.f32 %v2386_v56 }
0x268d   :  { %v3377_v49 = vpop.eup %3376 }
0x268e   :  { %2397 = vrot.lane.b32.xlu1 %v3377_v49, %s3625_s17  ;;  %v2647_v49 = vld [vmem:[#allocation11 + $0x18] sm:$0xff] }
0x2691   :  { %v3379_v8 = vpop.eup %3378 }
0x2692   :  { %v2388_v9 = vadd.f32 1.0, %v3379_v8 }
0x2694   :  { %3380 = vrcp.f32 %v2388_v9 }
0x269e   :  { %v3381_v24 = vpop.eup %3380 }
0x269f   :  { %v2395_v17 = vmul.f32 %v3381_v24, %v2393_v45 }
0x2700   :  { %v2398_v33 = vpop.permute.xlu1 %2397 }
0x2701   :  { %v2400_v21 = vmul.f32 %v3381_v24, %v2398_v33 }
0x2703   :  { %2402 = vrot.lane.b32.xlu0 %v2400_v21, %s3611_s23 }
0x2775   :  { %v2403_v19 = vpop.permute.xlu0 %2402 }
0x2776   :  { %v2405_v20 = vadd.f32 %v2403_v19, %v2395_v17 }
0x2778   :  { %3382 = vtanh.f32 %v2405_v20  ;;  %v2500_v44 = vrot.slane %v2405_v20, 6 }
0x2782   :  { %v3383_v22 = vpop.eup %3382 }
0x2783   :  { %2408 = vrot.lane.b32.xlu1 %v3383_v22, %s3625_s17 }
0x27f5   :  { %v2409_v23 = vpop.permute.xlu1 %2408 }
0x27f6   :  { %v2411_v25 = vmul.f32 %v3381_v24, %v2409_v23 }
0x27f8   :  { %v2413_v26 = vrot.slane %v2411_v25, 2  ;;  %v2641_v18 = vsel %vm1667_vm14, %v4304_v6, %v2411_v25 }
0x27fa   :  { %2414 = vrot.lane.b32.xlu0 %v2413_v26, %s3611_s23 }
0x286c   :  { %v2415_v27 = vpop.permute.xlu0 %2414 }
0x286d   :  { %3111 = vmatmul.mubr.msk.f32.vlgmr.msra.gmra.mrb[16].mxu0 %vm809_vm4, %v2415_v27 }
0x2940   :  { %v2484_v30 = vpop.f32.mrb[16].mxu0 }
0x2941   :  { %v2489_v31 = vrot.slane %v2484_v30, 4  ;;  %v3112_v32 = vpop.f32.mrb[17].mxu0 }
0x2943   :  { %v2491_v34 = vadd.f32 %v2489_v31, %v4240_v0 }
0x2945   :  { %3384 = vtanh.f32 %v2491_v34  ;;  %v2492_v14 = vsub.f32 0.0, %v2491_v34 }
0x2947   :  { %v2493_v36 = vmul.f32 1.442695, %v2492_v14 }
0x2949   :  { %3386 = vpow2.f32 %v2493_v36 }
0x294f   :  { %v3385_v35 = vpop.eup %3384 }
0x2950   :  { %2504 = vrot.lane.b32.xlu1 %v3385_v35, %s3625_s17 }
0x2953   :  { %v3387_v37 = vpop.eup %3386 }
0x2954   :  { %v2495_v38 = vadd.f32 1.0, %v3387_v37 }
0x2956   :  { %3388 = vrcp.f32 %v2495_v38 }
0x2960   :  { %v3389_v40 = vpop.eup %3388 }
0x2961   :  { %v2502_v46 = vmul.f32 %v3389_v40, %v2500_v44 }
0x29c2   :  { %v2505_v41 = vpop.permute.xlu1 %2504 }
0x29c3   :  { %v2507_v42 = vmul.f32 %v3389_v40, %v2505_v41 }
0x29c5   :  { %2509 = vrot.lane.b32.xlu0 %v2507_v42, %s3611_s23 }
0x2a37   :  { %v2510_v47 = vpop.permute.xlu0 %2509 }
0x2a38   :  { %v2512_v16 = vadd.f32 %v2510_v47, %v2502_v46 }
0x2a3a   :  { %3390 = vtanh.f32 %v2512_v16 }
0x2a44   :  { %v3391_v48 = vpop.eup %3390 }
0x2a45   :  { %2515 = vrot.lane.b32.xlu1 %v3391_v48, %s3625_s17 }
0x2ab7   :  { %v2516_v50 = vpop.permute.xlu1 %2515 }
0x2ab8   :  { %v2518_v51 = vmul.f32 %v3389_v40, %v2516_v50 }
0x2aba   :  { %v2520_v54 = vrot.slane %v2518_v51, 4  ;;  %v2642_v55 = vsel %vm1669_vm15, %v2641_v18, %v2518_v51 }
0x2abc   :  { %2521 = vrot.lane.b32.xlu0 %v2520_v54, %s3611_s23 }
0x2b2e   :  { %v2522_v53 = vpop.permute.xlu0 %2521 }
0x2b2f   :  { %3122 = vmatmul.mubr.msk.f32.vlgmr.msra.gmra.mrb[16].mxu1 %vm809_vm4, %v2522_v53 }
0x2c02   :  { %v2591_v57 = vpop.f32.mrb[16].mxu1 }
0x2c03   :  { %v2596_v59 = vrot.slane %v2591_v57, 2  ;;  %v3123_v60 = vpop.f32.mrb[17].mxu1 }
0x2c05   :  { %v2598_v13 = vadd.f32 %v2596_v59, %v4240_v0  ;;  %v2607_v0 = vrot.slane %v2512_v16, 6 }
0x2c07   :  { %3392 = vtanh.f32 %v2598_v13  ;;  %v2599_v1 = vsub.f32 0.0, %v2598_v13 }
0x2c09   :  { %v2600_v2 = vmul.f32 1.442695, %v2599_v1 }
0x2c0b   :  { %3394 = vpow2.f32 %v2600_v2 }
0x2c11   :  { %v3393_v62 = vpop.eup %3392 }
0x2c12   :  { %2611 = vrot.lane.b32.xlu1 %v3393_v62, %s3625_s17 }
0x2c15   :  { %v3395_v3 = vpop.eup %3394 }
0x2c16   :  { %v2602_v43 = vadd.f32 1.0, %v3395_v3 }
0x2c18   :  { %3396 = vrcp.f32 %v2602_v43 }
0x2c22   :  { %v3397_v4 = vpop.eup %3396 }
0x2c23   :  { %v2609_v28 = vmul.f32 %v3397_v4, %v2607_v0 }
0x2c84   :  { %v2612_v5 = vpop.permute.xlu1 %2611 }
0x2c85   :  { %v2614_v7 = vmul.f32 %v3397_v4, %v2612_v5 }
0x2c87   :  { %2616 = vrot.lane.b32.xlu0 %v2614_v7, %s3611_s23 }
0x2c8b   :  { %2657 = vrot.lane.b32.xlu0 %v4291_v52, %s3611_s23 }
0x2c8f   :  { %1657 = vrot.lane.b32.xlu0 %v4223_v11, %s3611_s23  ;;  %v2646_v11 = vld [vmem:[#allocation11 + $0x10] sm:$0xff] }
0x2c90   :  { %v3247_v15 = vpack.c.bf16 %v2647_v49, %v2646_v11 }
0x2c93   :  { %1663 = vrot.lane.b32.xlu0 %v4202_v63, %s3626_s9  ;;  %v3243_v63 = vpack.c.bf16 %v2645_v61, %v2644_v58 }
0x2c95   :  { %3244 = vmatprep.subr.bf16.mxu0 %v3243_v63 }
0x2c96   :  { %3246 = vmatpush3.bf16.msra.mxu0 %v3243_v63 }
0x2c97   :  { %3248 = vmatprep.subr.bf16.mxu0 %v3247_v15 }
0x2c9a   :  { %3250 = vmatpush3.bf16.msra.mxu0 %v3247_v15 }
0x2cf9   :  { %v2617_v39 = vpop.permute.xlu0 %2616 }
0x2cfa   :  { %v2619_v6 = vadd.f32 %v2617_v39, %v2609_v28 }
0x2cfc   :  { %3398 = vtanh.f32 %v2619_v6 }
0x2cfd   :  { %v2658_v10 = vpop.permute.xlu0 %2657 }
0x2cfe   :  { %3132 = vmatprep.mubr.msk.f32.mxu0 %vm809_vm4, %v2658_v10 }
0x2d01   :  { %v1658_v29 = vpop.permute.xlu0 %1657 }
0x2d02   :  { %1661 = vst.msk [vmem:[#allocation14 - $0x6] sm:$0xc0] %vm1660_vm1, %v1658_v29 }
0x2d05   :  { %v1664_v52 = vpop.permute.xlu0 %1663 }
0x2d06   :  { %v3399_v12 = vpop.eup %3398  ;;  %1666 = vst.msk [vmem:[#allocation16 - $0x6] sm:$0xc0] %vm1660_vm1, %v1664_v52 }
0x2d07   :  { %2622 = vrot.lane.b32.xlu1 %v3399_v12, %s3625_s17 }
0x2d79   :  { %v2623_v56 = vpop.permute.xlu1 %2622 }
0x2d7a   :  { %v2625_v8 = vmul.f32 %v3397_v4, %v2623_v56 }
0x2d7c   :  { %v2643_v9 = vsel %vm1671_vm0, %v2642_v55, %v2625_v8 }
0x2d7d   :  { %2659 = vrot.lane.b32.xlu1 %v2643_v9, %s3611_s23 }
0x2d81   :  { %2627 = vrot.lane.b32.xlu1 %v2625_v8, %s3611_s23 }
0x2d85   :  { %2633 = vrot.lane.b32.xlu1 %v2619_v6, %s3626_s9 }
0x2def   :  { %v2660_v24 = vpop.permute.xlu1 %2659 }
0x2df0   :  { %3133 = vmatmul.mubr.msk.f32.vlgmr.msra.gmra.mrb[18].mxu0 %vm809_vm4, %v2660_v24 }
0x2df3   :  { %v2628_v33 = vpop.permute.xlu1 %2627 }
0x2df4   :  { %2631 = vst.msk [vmem:[#allocation14 - $0x4] sm:$0xc0] %vm1660_vm1, %v2628_v33 }
0x2df7   :  { %v2634_v21 = vpop.permute.xlu1 %2633 }
0x2df8   :  { %2637 = vst.msk [vmem:[#allocation16 - $0x4] sm:$0xc0] %vm1660_vm1, %v2634_v21 }
0x2df9   :  { %3543 = shalt.err (!%p3540_p10)
}
0x2dfa   :  { %s3544_s0 = scalar_lea.hbm %s4410_s13, 64 }
0x2dfb   :  { %p3545_p11 = scmp.ne.s32.totalorder %s4410_s13, %s3544_s0  ;;  %p3548_p12 = scmp.lt.u32.totalorder %s3544_s0, %s4410_s13 }
0x2dfd   :  { %p3550_p13 = pnand %p3548_p12, %p3545_p11 }
0x2dff   :  { %3553 = shalt.err (!%p3550_p13)
}
0x2e00   :  { %2765 = dma.vmem_to_hbm [thread:$0]  %s2760_s18, 64, %s4410_s13, [#allocation15], %s3611_s23, %s3611_s23, %s3612_s24  }
0x2e01   :  { %s3628_s15 = smov [#allocation16]  }
0x2e02   :  { %s2771_s7 = sshll.u32 %s3628_s15, 4  ;;  %s2772_s7 = int_to_ptr.vmem [resolvable:$true] %s2771_s7 }
0x2e03   :  { %s3554_s28 = scalar_lea.vmem %s2772_s7, 64  ;;  %p3559_p1 = scmp.lt.s32.totalorder %s2772_s7, %s2772_s7 }
0x2e04   :  { %p3555_p0 = scmp.ne.s32.totalorder %s2772_s7, %s3554_s28  ;;  %p3560_p2 = scmp.lt.s32.totalorder %s3554_s28, %s3554_s28 }
0x2e06   :  { %p3561_p3 = por %p3560_p2, %p3559_p1 }
0x2e08   :  { %p3562_p4 = pnand %p3561_p3, %p3555_p0 }
0x2e0a   :  { %3565 = shalt.err (!%p3562_p4)
}
0x2e0b   :  { %s3566_s5 = scalar_lea.hbm %s4411_s14, 64 }
0x2e0c   :  { %p3567_p5 = scmp.ne.s32.totalorder %s4411_s14, %s3566_s5  ;;  %p3570_p6 = scmp.lt.u32.totalorder %s3566_s5, %s4411_s14 }
0x2e0e   :  { %p3572_p7 = pnand %p3570_p6, %p3567_p5 }
0x2e10   :  { %3575 = shalt.err (!%p3572_p7)
}
0x2e11   :  { %2777 = dma.vmem_to_hbm [thread:$0]  %s2772_s7, 64, %s4411_s14, [#allocation15], %s3611_s23, %s3611_s23, %s3612_s24  }
0x2e12   :  { %v2831_v45 = vld [vmem:[%s4408_s11] ss:$0 sm:$0xff]  ;;  %s3629_s19 = smov [#allocation13]  }
0x2e13   :  { %s2747_s20 = sshll.u32 %s3629_s19, 4  ;;  %s2748_s20 = int_to_ptr.vmem [resolvable:$true] %s2747_s20 }
0x2e14   :  { %s3576_s4 = scalar_lea.vmem %s2748_s20, 256  ;;  %p3581_p9 = scmp.lt.s32.totalorder %s2748_s20, %s2748_s20 }
0x2e15   :  { %p3577_p8 = scmp.ne.s32.totalorder %s2748_s20, %s3576_s4  ;;  %p3582_p10 = scmp.lt.s32.totalorder %s3576_s4, %s3576_s4 }
0x2e17   :  { %p3583_p11 = por %p3582_p10, %p3581_p9 }
0x2e19   :  { %p3584_p12 = pnand %p3583_p11, %p3577_p8 }
0x2ec3   :  { %v3134_v17 = vpop.f32.mrb[18].mxu0 }
0x2ec4   :  { %v2737_v19 = vadd.f32 %v3134_v17, %v2831_v45  ;;  %v2731_v20 = vpop.f32.mrb[19].mxu0 }
0x2ec5   :  { %v2732_v22 = vadd.f32 %v2831_v45, %v2731_v20 }
0x2ec6   :  { %2741 = vst [vmem:[#allocation13 + $0x8] sm:$0xff] %v2737_v19 }
0x2ec7   :  { %2740 = vst [vmem:[#allocation13] sm:$0xff] %v2732_v22 }
0x2ec8   :  { %3587 = shalt.err (!%p3584_p12)
}
0x2ec9   :  { %s3588_s11 = scalar_lea.hbm %s4409_s12, 256 }
0x2eca   :  { %p3589_p13 = scmp.ne.s32.totalorder %s4409_s12, %s3588_s11  ;;  %p3592_p0 = scmp.lt.u32.totalorder %s3588_s11, %s4409_s12 }
0x2ecc   :  { %p3594_p1 = pnand %p3592_p0, %p3589_p13 }
0x2ece   :  { %3597 = shalt.err (!%p3594_p1)
}
0x2ecf   :  { %2753 = dma.vmem_to_hbm [thread:$0]  %s2748_s20, 256, %s4409_s12, [#allocation4], %s3615_s30, %s3615_s30, %s3616_s25  }
0x2ed0   :  { %3606 = dma.done.wait [#allocation4], 256  }
0x2ed1   :  { %3607 = vsyncadd [#allocation4], 4294967040 }
0x2ed2   :  { %3608 = dma.done.wait [#allocation15], 128  }
0x2ed3   :  { %3609 = vsyncadd [#allocation15], 4294967168 }
0x2ed4   :  { %2787 = vsyncpa [#allocation3], 1 }
0x2ed5   :  { %2788 = vsyncpa [#allocation6], 1 }
0x2ed6   :  { %2789 = vsyncpa [#allocation9], 1 }
0x2ed7   :  { %2790 = vsyncpa [#allocation12], 1 }
0x2ed8   :  { %2791 = vsyncpa [#allocation4], 1 }
0x2ed9   :  { %2792 = vsyncpa [#allocation15], 1 }

</bundles_post_ra>
